<compile_context>
chip_gen: v6e
topology: v6e:2x2x1
jax: 0.10.0
libtpu: 0.0.40
codegen_flags: <defaults>
</compile_context>

<pallas_src>
import functools

import jax
import jax.numpy as jnp
from jax.experimental import pallas as pl
from jax.experimental.pallas import tpu as pltpu

NEG_SLOPE = 0.01  # torch.nn.LeakyReLU default


def _leaky(v):
    return jnp.where(v >= 0, v, NEG_SLOPE * v)


def _chunk_coeffs(n_layers):
    """Negative-branch coefficient of each concatenated feature chunk.

    forward's concat quirk gives y_ = [y1, y1, y2, ..., y_{n-1}] (y0 dropped,
    y1 duplicated), and y_k = mean(leaky^(k+1)(x)) = p_pos + NEG_SLOPE**(k+1)*p_neg.
    Returned as plain Python floats so the kernel only captures scalars.
    """
    idx = [1] + list(range(1, n_layers))
    return tuple(float(NEG_SLOPE ** (k + 1)) for k in idx)


def _tcnn_kernel(x_ref, wpos_ref, wneg_ref, b1_ref, w2_ref, b2_ref,
                 w3_ref, b3_ref, w4_ref, b4_ref,
                 logits_ref, feat_ref, ppos_acc, pneg_acc,
                 *, coeffs, inv_spatial):
    s = pl.program_id(1)

    @pl.when(s == 0)
    def _():
        ppos_acc[...] = jnp.zeros_like(ppos_acc)
        pneg_acc[...] = jnp.zeros_like(pneg_acc)

    # Closed-form pooling: one VPU pass + one lane reduction per spatial tile
    # replaces nine full LeakyReLU passes + nine AdaptiveAvgPool reductions.
    # x stays in its native dtype (bf16 or f32); accumulate in f32.
    x = x_ref[...]                                                    # (tb, C, ts)
    ppos_acc[...] += jnp.sum(jnp.maximum(x, 0).astype(jnp.float32), axis=-1)
    pneg_acc[...] += jnp.sum(jnp.minimum(x, 0).astype(jnp.float32), axis=-1)

    @pl.when(s == pl.num_programs(1) - 1)
    def _():
        p_pos = ppos_acc[...] * inv_spatial                           # (tb, C) f32
        p_neg = pneg_acc[...] * inv_spatial                           # (tb, C) f32

        # Feature output: chunk k = p_pos + coeff_k * p_neg.  coeffs are Python
        # scalars, so no array constants are captured by the kernel.
        for k, c in enumerate(coeffs):
            feat_ref[:, k, :] = p_pos + c * p_neg

        # third_block: Linear + LeakyReLU x 4.  The first (540-wide) Linear is
        # pre-folded into f32 W_pos / W_neg (tiny, kept f32 for accuracy); the
        # remaining Linears run as bf16 x bf16 MXU matmuls with f32 accumulation.
        h = _leaky(jnp.dot(p_pos, wpos_ref[...], preferred_element_type=jnp.float32)
                   + jnp.dot(p_neg, wneg_ref[...], preferred_element_type=jnp.float32)
                   + b1_ref[...])
        for w_ref, b_ref in ((w2_ref, b2_ref), (w3_ref, b3_ref), (w4_ref, b4_ref)):
            h = _leaky(jnp.dot(h.astype(jnp.bfloat16), w_ref[...],
                               preferred_element_type=jnp.float32) + b_ref[...])
        logits_ref[...] = h


def _round_up(a, m):
    return -(-a // m) * m


def _vmem_budget():
    """(x double-buffer budget, explicit vmem_limit_bytes) sized per generation.

    v5e/v6e: 128 MiB physical VMEM -> big tiles; v7x: 64 MiB per TensorCore.
    Falls back to the conservative (v7x) numbers if the query fails.
    """
    cap = 64 * 2 ** 20
    try:
        info = pltpu.get_tpu_info()
        cap = int(getattr(info, "vmem_capacity_bytes", cap)) or cap
    except Exception:
        pass
    x_budget = min(int(cap * 0.4), 48 * 2 ** 20)
    vmem_limit = max(32 * 2 ** 20, min(int(cap * 0.75), 100 * 2 ** 20))
    return x_budget, vmem_limit


_TS_CANDS = (2048, 1024, 512, 256, 128)


def _choose_tiles(B, C, S, itemsize, budget):
    """Pick (tb, ts, S_pad) so the double-buffered x tile fits `budget`.

    tb: largest multiple of 8 dividing B (cap 128 = MXU rows), preferring
        >= 2 batch tiles so the 'parallel' axis can feed both v7x TensorCores.
    ts: whole spatial extent if it fits (no pad), else the largest lane-dense
        (multiple-of-128) tile whose zero-padding waste stays small.
    """
    if B % 8 == 0:
        tb_cands = [t for t in range(min(B, 128), 7, -8) if B % t == 0]
        if len(tb_cands) > 1 and B // tb_cands[0] == 1:
            tb_cands = tb_cands[1:] + tb_cands[:1]       # prefer grid[0] >= 2
    else:
        # TODO(synk): pad/mask the batch axis for large B not divisible by 8.
        tb_cands = [B]

    for tb in tb_cands:
        if 2 * tb * C * S * itemsize <= budget:
            return tb, S, S                               # one spatial step, no pad
        for ts in _TS_CANDS:
            s_pad = _round_up(S, ts)
            if (s_pad - S) <= max(S // 8, 128) and 2 * tb * C * ts * itemsize <= budget:
                return tb, ts, s_pad
    return tb_cands[-1], 128, _round_up(S, 128)           # last resort


def tcnn_forward(x, kparams, *, n_layers):
    """Pallas forward. `kparams` comes from prepare_params. Returns (logits, y_)."""
    B, C, H, W = x.shape
    S = H * W
    w_pos, w_neg, b1, w2, b2, w3, b3, w4, b4 = kparams
    num_classes = w4.shape[-1]
    n_chunks = n_layers
    coeffs = _chunk_coeffs(n_layers)

    # Stream x in its native dtype; the kernel casts per tile (no extra HBM copy).
    x3 = x.reshape(B, C, S)
    itemsize = jnp.dtype(x.dtype).itemsize

    x_budget, vmem_limit = _vmem_budget()
    tb, ts, S_pad = _choose_tiles(B, C, S, itemsize, x_budget)
    if S_pad != S:
        # Zero padding is exact: zeros add nothing to the p_pos / p_neg sums and
        # the kernel divides by the true S.
        x3 = jnp.pad(x3, ((0, 0), (0, 0), (0, S_pad - S)))

    grid = (B // tb, S_pad // ts)

    def _const_spec(shape):
        nd = len(shape)
        return pl.BlockSpec(shape, lambda b, s, _nd=nd: (0,) * _nd)

    in_specs = [pl.BlockSpec((tb, C, ts), lambda b, s: (b, 0, s))]
    in_specs += [_const_spec(a.shape)
                 for a in (w_pos, w_neg, b1, w2, b2, w3, b3, w4, b4)]
    out_specs = (
        pl.BlockSpec((tb, num_classes), lambda b, s: (b, 0)),
        pl.BlockSpec((tb, n_chunks, C), lambda b, s: (b, 0, 0)),
    )

    kernel = functools.partial(_tcnn_kernel, coeffs=coeffs, inv_spatial=1.0 / S)

    logits, feat = pl.pallas_call(
        kernel,
        out_shape=(
            jax.ShapeDtypeStruct((B, num_classes), jnp.float32),
            jax.ShapeDtypeStruct((B, n_chunks, C), jnp.float32),
        ),
        grid_spec=pltpu.PrefetchScalarGridSpec(
            num_scalar_prefetch=0,
            grid=grid,
            in_specs=in_specs,
            out_specs=out_specs,
            scratch_shapes=[pltpu.VMEM((tb, C), jnp.float32),
                            pltpu.VMEM((tb, C), jnp.float32)],
        ),
        compiler_params=pltpu.CompilerParams(
            dimension_semantics=("parallel", "arbitrary"),
            vmem_limit_bytes=vmem_limit),
    )(x3, w_pos, w_neg, b1, w2, b2, w3, b3, w4, b4)

    # (B, n_chunks, C) -> (B, n_chunks*C): free row-major view, matches
    # torch.cat([...], dim=1) chunk ordering.
    y_ = feat.reshape(B, n_chunks * C)
    return logits, y_


def init_params(key, channels_cnn, hidden_fc, num_classes):
    """Faithful third_block params: xavier_uniform weights stored (in, out),
    torch-default uniform biases.  first_block conv weights are unused in forward."""
    size_fc = [sum(channels_cnn[:-1])] + list(hidden_fc) + [num_classes]
    keys = jax.random.split(key, 2 * (len(size_fc) - 1))
    params = []
    for li in range(len(size_fc) - 1):
        fan_in, fan_out = size_fc[li], size_fc[li + 1]
        limit = (6.0 / (fan_in + fan_out)) ** 0.5
        w = jax.random.uniform(keys[2 * li], (fan_in, fan_out), jnp.float32, -limit, limit)
        bb = 1.0 / (fan_in ** 0.5)
        b = jax.random.uniform(keys[2 * li + 1], (1, fan_out), jnp.float32, -bb, bb)
        params += [w, b]
    return params


def prepare_params(params, channels_cnn):
    """One-time (outside jit) kernel-param prep: fold the first Linear's row
    blocks into W_pos/W_neg (kept f32 -- tiny, keeps the first layer exact) and
    cast the remaining matmul weights to bf16 for native-bf16 MXU matmuls."""
    w1, b1, w2, b2, w3, b3, w4, b4 = params
    C = channels_cnn[0]
    n_layers = len(channels_cnn) - 1
    coeffs = jnp.asarray(_chunk_coeffs(n_layers), jnp.float32)
    w1b = w1.reshape(n_layers, C, w1.shape[-1]).astype(jnp.float32)
    w_pos = jnp.sum(w1b, axis=0)                              # multiplies p_pos
    w_neg = jnp.tensordot(coeffs, w1b, axes=1)                # multiplies p_neg
    bf = lambda a: a.astype(jnp.bfloat16)
    return (w_pos, w_neg, b1, bf(w2), b2, bf(w3), b3, bf(w4), b4)


def tcnn_reference(x, params):
    """Pure-JAX mirror of the PyTorch forward, for correctness checking."""
    w1, b1, w2, b2, w3, b3, w4, b4 = params
    n_layers = w1.shape[0] // x.shape[1]
    xx = x.astype(jnp.float32)
    y_ = None
    for i in range(n_layers):
        xx = jnp.where(xx >= 0, xx, NEG_SLOPE * xx)
        y = jnp.mean(xx, axis=(2, 3))
        if i == 1:
            y_ = y
        y_ = y if y_ is None else jnp.concatenate([y_, y], axis=1)
    h = y_
    for w, b in ((w1, b1), (w2, b2), (w3, b3), (w4, b4)):
        h = h @ w + b
        h = jnp.where(h >= 0, h, NEG_SLOPE * h)
    return h, y_


if __name__ == "__main__":
    # module defaults, small spatial / batch
    num_classes = 10
    channels_cnn = [60] * 10
    hidden_fc = [512, 256, 128]
    B, H, W = 2, 8, 8
    n_layers = len(channels_cnn) - 1

    key = jax.random.PRNGKey(0)
    kx, kp = jax.random.split(key)
    x = jax.random.normal(kx, (B, channels_cnn[0], H, W), jnp.float32)
    params = init_params(kp, channels_cnn, hidden_fc, num_classes)
    kparams = prepare_params(params, channels_cnn)

    fwd = jax.jit(functools.partial(tcnn_forward, n_layers=n_layers))
    logits, feat = fwd(x, kparams)
    jax.block_until_ready((logits, feat))

    ref_logits, ref_feat = tcnn_reference(x, params)
    assert logits.shape == (B, num_classes)
    assert feat.shape == (B, sum(channels_cnn[:-1]))
    assert jnp.allclose(feat, ref_feat, atol=1e-5, rtol=1e-4)
    scale = float(jnp.max(jnp.abs(ref_logits))) + 1e-6
    assert float(jnp.max(jnp.abs(logits - ref_logits))) / scale < 5e-2

    print("KERNEL_OK")
</pallas_src>

<mosaic_0001>
module attributes {stable_mosaic.version = 11 : i64} {
  func.func @_tcnn_kernel(%arg0: i32, %arg1: i32, %arg2: memref<2x60x64xf32, #tpu.memory_space<vmem>>, %arg3: memref<60x512xf32, #tpu.memory_space<vmem>>, %arg4: memref<60x512xf32, #tpu.memory_space<vmem>>, %arg5: memref<1x512xf32, #tpu.memory_space<vmem>>, %arg6: memref<512x256xbf16, #tpu.memory_space<vmem>>, %arg7: memref<1x256xf32, #tpu.memory_space<vmem>>, %arg8: memref<256x128xbf16, #tpu.memory_space<vmem>>, %arg9: memref<1x128xf32, #tpu.memory_space<vmem>>, %arg10: memref<128x10xbf16, #tpu.memory_space<vmem>>, %arg11: memref<1x10xf32, #tpu.memory_space<vmem>>, %arg12: memref<2x10xf32, #tpu.memory_space<vmem>>, %arg13: memref<2x9x60xf32, #tpu.memory_space<vmem>>, %arg14: memref<2x60xf32, #tpu.memory_space<vmem>>, %arg15: memref<2x60xf32, #tpu.memory_space<vmem>>) attributes {dimension_semantics = [#tpu.dimension_semantics<parallel>, #tpu.dimension_semantics<arbitrary>], iteration_bounds = array<i64: 1, 1>, scalar_prefetch = 0 : i64, scratch_operands = 2 : i64, tpu.core_type = #tpu.core_type<tc>, window_params = [{transform_indices = @transform_0, window_bounds = array<i64: 2, 60, 64>}, {pipeline_mode = #tpu.pipeline_mode<synchronous>, transform_indices = @transform_1, window_bounds = array<i64: 60, 512>}, {pipeline_mode = #tpu.pipeline_mode<synchronous>, transform_indices = @transform_2, window_bounds = array<i64: 60, 512>}, {pipeline_mode = #tpu.pipeline_mode<synchronous>, transform_indices = @transform_3, window_bounds = array<i64: 1, 512>}, {pipeline_mode = #tpu.pipeline_mode<synchronous>, transform_indices = @transform_4, window_bounds = array<i64: 512, 256>}, {pipeline_mode = #tpu.pipeline_mode<synchronous>, transform_indices = @transform_5, window_bounds = array<i64: 1, 256>}, {pipeline_mode = #tpu.pipeline_mode<synchronous>, transform_indices = @transform_6, window_bounds = array<i64: 256, 128>}, {pipeline_mode = #tpu.pipeline_mode<synchronous>, transform_indices = @transform_7, window_bounds = array<i64: 1, 128>}, {pipeline_mode = #tpu.pipeline_mode<synchronous>, transform_indices = @transform_8, window_bounds = array<i64: 128, 10>}, {pipeline_mode = #tpu.pipeline_mode<synchronous>, transform_indices = @transform_9, window_bounds = array<i64: 1, 10>}, {transform_indices = @transform_10, window_bounds = array<i64: 2, 10>}, {transform_indices = @transform_11, window_bounds = array<i64: 2, 9, 60>}]} {
    %c0_i32 = arith.constant 0 : i32
    %0 = arith.cmpi eq, %arg1, %c0_i32 : i32
    %1 = arith.extui %0 : i1 to i32
    %c0_i32_0 = arith.constant 0 : i32
    %2 = arith.cmpi ne, %1, %c0_i32_0 : i32
    scf.if %2 {
      %cst_16 = arith.constant 0.000000e+00 : f32
      %19 = vector.broadcast %cst_16 : f32 to vector<2x60xf32>
      %c0_17 = arith.constant 0 : index
      %c0_18 = arith.constant 0 : index
      %20 = vector.load %arg14[%c0_17, %c0_18] : memref<2x60xf32, #tpu.memory_space<vmem>>, vector<2x60xf32>
      tpu.vector_store %arg14[%c0_17, %c0_18], %19 {strides = array<i32>} : memref<2x60xf32, #tpu.memory_space<vmem>>, vector<2x60xf32>,
      %cst_19 = arith.constant 0.000000e+00 : f32
      %21 = vector.broadcast %cst_19 : f32 to vector<2x60xf32>
      %c0_20 = arith.constant 0 : index
      %c0_21 = arith.constant 0 : index
      %22 = vector.load %arg15[%c0_20, %c0_21] : memref<2x60xf32, #tpu.memory_space<vmem>>, vector<2x60xf32>
      tpu.vector_store %arg15[%c0_20, %c0_21], %21 {strides = array<i32>} : memref<2x60xf32, #tpu.memory_space<vmem>>, vector<2x60xf32>,
    } else {
    }
    %c0 = arith.constant 0 : index
    %c0_1 = arith.constant 0 : index
    %c0_2 = arith.constant 0 : index
    %3 = vector.load %arg2[%c0, %c0_1, %c0_2] : memref<2x60x64xf32, #tpu.memory_space<vmem>>, vector<2x60x64xf32>
    %c0_3 = arith.constant 0 : index
    %c0_4 = arith.constant 0 : index
    %4 = vector.load %arg14[%c0_3, %c0_4] : memref<2x60xf32, #tpu.memory_space<vmem>>, vector<2x60xf32>
    %cst = arith.constant 0.000000e+00 : f32
    %5 = vector.broadcast %cst : f32 to vector<2x60x64xf32>
    %6 = arith.maximumf %3, %5 : vector<2x60x64xf32>
    %cst_5 = arith.constant dense<0.000000e+00> : vector<2x60xf32>
    %7 = vector.multi_reduction <add>, %6, %cst_5 [2] : vector<2x60x64xf32> to vector<2x60xf32>
    %8 = arith.addf %4, %7 : vector<2x60xf32>
    %c0_6 = arith.constant 0 : index
    %c0_7 = arith.constant 0 : index
    %9 = vector.load %arg14[%c0_6, %c0_7] : memref<2x60xf32, #tpu.memory_space<vmem>>, vector<2x60xf32>
    tpu.vector_store %arg14[%c0_6, %c0_7], %8 {strides = array<i32>} : memref<2x60xf32, #tpu.memory_space<vmem>>, vector<2x60xf32>,
    %c0_8 = arith.constant 0 : index
    %c0_9 = arith.constant 0 : index
    %10 = vector.load %arg15[%c0_8, %c0_9] : memref<2x60xf32, #tpu.memory_space<vmem>>, vector<2x60xf32>
    %cst_10 = arith.constant 0.000000e+00 : f32
    %11 = vector.broadcast %cst_10 : f32 to vector<2x60x64xf32>
    %12 = arith.minimumf %3, %11 : vector<2x60x64xf32>
    %cst_11 = arith.constant dense<0.000000e+00> : vector<2x60xf32>
    %13 = vector.multi_reduction <add>, %12, %cst_11 [2] : vector<2x60x64xf32> to vector<2x60xf32>
    %14 = arith.addf %10, %13 : vector<2x60xf32>
    %c0_12 = arith.constant 0 : index
    %c0_13 = arith.constant 0 : index
    %15 = vector.load %arg15[%c0_12, %c0_13] : memref<2x60xf32, #tpu.memory_space<vmem>>, vector<2x60xf32>
    tpu.vector_store %arg15[%c0_12, %c0_13], %14 {strides = array<i32>} : memref<2x60xf32, #tpu.memory_space<vmem>>, vector<2x60xf32>,
    %c0_i32_14 = arith.constant 0 : i32
    %16 = arith.cmpi eq, %arg1, %c0_i32_14 : i32
    %17 = arith.extui %16 : i1 to i32
    %c0_i32_15 = arith.constant 0 : i32
    %18 = arith.cmpi ne, %17, %c0_i32_15 : i32
    scf.if %18 {
      %c0_16 = arith.constant 0 : index
      %c0_17 = arith.constant 0 : index
      %19 = vector.load %arg14[%c0_16, %c0_17] : memref<2x60xf32, #tpu.memory_space<vmem>>, vector<2x60xf32>
      %cst_18 = arith.constant 1.562500e-02 : f32
      %20 = vector.broadcast %cst_18 : f32 to vector<2x60xf32>
      %21 = arith.mulf %19, %20 : vector<2x60xf32>
      %c0_19 = arith.constant 0 : index
      %c0_20 = arith.constant 0 : index
      %22 = vector.load %arg15[%c0_19, %c0_20] : memref<2x60xf32, #tpu.memory_space<vmem>>, vector<2x60xf32>
      %cst_21 = arith.constant 1.562500e-02 : f32
      %23 = vector.broadcast %cst_21 : f32 to vector<2x60xf32>
      %24 = arith.mulf %22, %23 : vector<2x60xf32>
      %cst_22 = arith.constant 9.99999974E-5 : f32
      %25 = vector.broadcast %cst_22 : f32 to vector<2x60xf32>
      %26 = arith.mulf %25, %24 : vector<2x60xf32>
      %27 = arith.addf %21, %26 : vector<2x60xf32>
      %c0_23 = arith.constant 0 : index
      %c0_24 = arith.constant 0 : index
      %c0_25 = arith.constant 0 : index
      %28 = vector.load %arg13[%c0_23, %c0_24, %c0_25] : memref<2x9x60xf32, #tpu.memory_space<vmem>>, vector<2x1x60xf32>
      %29 = vector.shape_cast %28 : vector<2x1x60xf32> to vector<2x60xf32>
      %30 = vector.shape_cast %27 : vector<2x60xf32> to vector<2x1x60xf32>
      tpu.vector_store %arg13[%c0_23, %c0_24, %c0_25], %30 {strides = array<i32>} : memref<2x9x60xf32, #tpu.memory_space<vmem>>, vector<2x1x60xf32>,
      %cst_26 = arith.constant 9.99999974E-5 : f32
      %31 = vector.broadcast %cst_26 : f32 to vector<2x60xf32>
      %32 = arith.mulf %31, %24 : vector<2x60xf32>
      %33 = arith.addf %21, %32 : vector<2x60xf32>
      %c0_27 = arith.constant 0 : index
      %c1 = arith.constant 1 : index
      %c0_28 = arith.constant 0 : index
      %34 = vector.load %arg13[%c0_27, %c1, %c0_28] : memref<2x9x60xf32, #tpu.memory_space<vmem>>, vector<2x1x60xf32>
      %35 = vector.shape_cast %34 : vector<2x1x60xf32> to vector<2x60xf32>
      %36 = vector.shape_cast %33 : vector<2x60xf32> to vector<2x1x60xf32>
      tpu.vector_store %arg13[%c0_27, %c1, %c0_28], %36 {strides = array<i32>} : memref<2x9x60xf32, #tpu.memory_space<vmem>>, vector<2x1x60xf32>,
      %cst_29 = arith.constant 9.99999997E-7 : f32
      %37 = vector.broadcast %cst_29 : f32 to vector<2x60xf32>
      %38 = arith.mulf %37, %24 : vector<2x60xf32>
      %39 = arith.addf %21, %38 : vector<2x60xf32>
      %c0_30 = arith.constant 0 : index
      %c2 = arith.constant 2 : index
      %c0_31 = arith.constant 0 : index
      %40 = vector.load %arg13[%c0_30, %c2, %c0_31] : memref<2x9x60xf32, #tpu.memory_space<vmem>>, vector<2x1x60xf32>
      %41 = vector.shape_cast %40 : vector<2x1x60xf32> to vector<2x60xf32>
      %42 = vector.shape_cast %39 : vector<2x60xf32> to vector<2x1x60xf32>
      tpu.vector_store %arg13[%c0_30, %c2, %c0_31], %42 {strides = array<i32>} : memref<2x9x60xf32, #tpu.memory_space<vmem>>, vector<2x1x60xf32>,
      %cst_32 = arith.constant 9.99999993E-9 : f32
      %43 = vector.broadcast %cst_32 : f32 to vector<2x60xf32>
      %44 = arith.mulf %43, %24 : vector<2x60xf32>
      %45 = arith.addf %21, %44 : vector<2x60xf32>
      %c0_33 = arith.constant 0 : index
      %c3 = arith.constant 3 : index
      %c0_34 = arith.constant 0 : index
      %46 = vector.load %arg13[%c0_33, %c3, %c0_34] : memref<2x9x60xf32, #tpu.memory_space<vmem>>, vector<2x1x60xf32>
      %47 = vector.shape_cast %46 : vector<2x1x60xf32> to vector<2x60xf32>
      %48 = vector.shape_cast %45 : vector<2x60xf32> to vector<2x1x60xf32>
      tpu.vector_store %arg13[%c0_33, %c3, %c0_34], %48 {strides = array<i32>} : memref<2x9x60xf32, #tpu.memory_space<vmem>>, vector<2x1x60xf32>,
      %cst_35 = arith.constant 1.000000e-10 : f32
      %49 = vector.broadcast %cst_35 : f32 to vector<2x60xf32>
      %50 = arith.mulf %49, %24 : vector<2x60xf32>
      %51 = arith.addf %21, %50 : vector<2x60xf32>
      %c0_36 = arith.constant 0 : index
      %c4 = arith.constant 4 : index
      %c0_37 = arith.constant 0 : index
      %52 = vector.load %arg13[%c0_36, %c4, %c0_37] : memref<2x9x60xf32, #tpu.memory_space<vmem>>, vector<2x1x60xf32>
      %53 = vector.shape_cast %52 : vector<2x1x60xf32> to vector<2x60xf32>
      %54 = vector.shape_cast %51 : vector<2x60xf32> to vector<2x1x60xf32>
      tpu.vector_store %arg13[%c0_36, %c4, %c0_37], %54 {strides = array<i32>} : memref<2x9x60xf32, #tpu.memory_space<vmem>>, vector<2x1x60xf32>,
      %cst_38 = arith.constant 9.99999996E-13 : f32
      %55 = vector.broadcast %cst_38 : f32 to vector<2x60xf32>
      %56 = arith.mulf %55, %24 : vector<2x60xf32>
      %57 = arith.addf %21, %56 : vector<2x60xf32>
      %c0_39 = arith.constant 0 : index
      %c5 = arith.constant 5 : index
      %c0_40 = arith.constant 0 : index
      %58 = vector.load %arg13[%c0_39, %c5, %c0_40] : memref<2x9x60xf32, #tpu.memory_space<vmem>>, vector<2x1x60xf32>
      %59 = vector.shape_cast %58 : vector<2x1x60xf32> to vector<2x60xf32>
      %60 = vector.shape_cast %57 : vector<2x60xf32> to vector<2x1x60xf32>
      tpu.vector_store %arg13[%c0_39, %c5, %c0_40], %60 {strides = array<i32>} : memref<2x9x60xf32, #tpu.memory_space<vmem>>, vector<2x1x60xf32>,
      %cst_41 = arith.constant 9.99999982E-15 : f32
      %61 = vector.broadcast %cst_41 : f32 to vector<2x60xf32>
      %62 = arith.mulf %61, %24 : vector<2x60xf32>
      %63 = arith.addf %21, %62 : vector<2x60xf32>
      %c0_42 = arith.constant 0 : index
      %c6 = arith.constant 6 : index
      %c0_43 = arith.constant 0 : index
      %64 = vector.load %arg13[%c0_42, %c6, %c0_43] : memref<2x9x60xf32, #tpu.memory_space<vmem>>, vector<2x1x60xf32>
      %65 = vector.shape_cast %64 : vector<2x1x60xf32> to vector<2x60xf32>
      %66 = vector.shape_cast %63 : vector<2x60xf32> to vector<2x1x60xf32>
      tpu.vector_store %arg13[%c0_42, %c6, %c0_43], %66 {strides = array<i32>} : memref<2x9x60xf32, #tpu.memory_space<vmem>>, vector<2x1x60xf32>,
      %cst_44 = arith.constant 1.000000e-16 : f32
      %67 = vector.broadcast %cst_44 : f32 to vector<2x60xf32>
      %68 = arith.mulf %67, %24 : vector<2x60xf32>
      %69 = arith.addf %21, %68 : vector<2x60xf32>
      %c0_45 = arith.constant 0 : index
      %c7 = arith.constant 7 : index
      %c0_46 = arith.constant 0 : index
      %70 = vector.load %arg13[%c0_45, %c7, %c0_46] : memref<2x9x60xf32, #tpu.memory_space<vmem>>, vector<2x1x60xf32>
      %71 = vector.shape_cast %70 : vector<2x1x60xf32> to vector<2x60xf32>
      %72 = vector.shape_cast %69 : vector<2x60xf32> to vector<2x1x60xf32>
      tpu.vector_store %arg13[%c0_45, %c7, %c0_46], %72 {strides = array<i32>} : memref<2x9x60xf32, #tpu.memory_space<vmem>>, vector<2x1x60xf32>,
      %cst_47 = arith.constant 1.000000e-18 : f32
      %73 = vector.broadcast %cst_47 : f32 to vector<2x60xf32>
      %74 = arith.mulf %73, %24 : vector<2x60xf32>
      %75 = arith.addf %21, %74 : vector<2x60xf32>
      %c0_48 = arith.constant 0 : index
      %c8 = arith.constant 8 : index
      %c0_49 = arith.constant 0 : index
      %76 = vector.load %arg13[%c0_48, %c8, %c0_49] : memref<2x9x60xf32, #tpu.memory_space<vmem>>, vector<2x1x60xf32>
      %77 = vector.shape_cast %76 : vector<2x1x60xf32> to vector<2x60xf32>
      %78 = vector.shape_cast %75 : vector<2x60xf32> to vector<2x1x60xf32>
      tpu.vector_store %arg13[%c0_48, %c8, %c0_49], %78 {strides = array<i32>} : memref<2x9x60xf32, #tpu.memory_space<vmem>>, vector<2x1x60xf32>,
      %c0_50 = arith.constant 0 : index
      %c0_51 = arith.constant 0 : index
      %79 = vector.load %arg3[%c0_50, %c0_51] : memref<60x512xf32, #tpu.memory_space<vmem>>, vector<60x512xf32>
      %cst_52 = arith.constant dense<0.000000e+00> : vector<2x512xf32>
      %80 = tpu.matmul %21, %79, %cst_52 {dimension_numbers = #tpu.dot_dimension_numbers<[1], [0], [0], [1], [0, 0, 1, 1], [], []>} : vector<2x60xf32>, vector<60x512xf32>, vector<2x512xf32> -> vector<2x512xf32>
      %c0_53 = arith.constant 0 : index
      %c0_54 = arith.constant 0 : index
      %81 = vector.load %arg4[%c0_53, %c0_54] : memref<60x512xf32, #tpu.memory_space<vmem>>, vector<60x512xf32>
      %cst_55 = arith.constant dense<0.000000e+00> : vector<2x512xf32>
      %82 = tpu.matmul %24, %81, %cst_55 {dimension_numbers = #tpu.dot_dimension_numbers<[1], [0], [0], [1], [0, 0, 1, 1], [], []>} : vector<2x60xf32>, vector<60x512xf32>, vector<2x512xf32> -> vector<2x512xf32>
      %83 = arith.addf %80, %82 : vector<2x512xf32>
      %c0_56 = arith.constant 0 : index
      %c0_57 = arith.constant 0 : index
      %84 = vector.load %arg5[%c0_56, %c0_57] : memref<1x512xf32, #tpu.memory_space<vmem>>, vector<1x512xf32>
      %85 = vector.broadcast %84 : vector<1x512xf32> to vector<2x512xf32>
      %86 = arith.addf %83, %85 : vector<2x512xf32>
      %cst_58 = arith.constant 0.000000e+00 : f32
      %87 = vector.broadcast %cst_58 : f32 to vector<2x512xf32>
      %88 = arith.cmpf oge, %86, %87 : vector<2x512xf32>
      %cst_59 = arith.constant 0.00999999977 : f32
      %89 = vector.broadcast %cst_59 : f32 to vector<2x512xf32>
      %90 = arith.mulf %89, %86 : vector<2x512xf32>
      %91 = arith.select %88, %86, %90 : vector<2x512xi1>, vector<2x512xf32>
      %92 = arith.truncf %91 : vector<2x512xf32> to vector<2x512xbf16>
      %c0_60 = arith.constant 0 : index
      %c0_61 = arith.constant 0 : index
      %93 = vector.load %arg6[%c0_60, %c0_61] : memref<512x256xbf16, #tpu.memory_space<vmem>>, vector<512x256xbf16>
      %cst_62 = arith.constant dense<0.000000e+00> : vector<2x256xf32>
      %94 = tpu.matmul %92, %93, %cst_62 {dimension_numbers = #tpu.dot_dimension_numbers<[1], [0], [0], [1], [0, 0, 1, 1], [], []>} : vector<2x512xbf16>, vector<512x256xbf16>, vector<2x256xf32> -> vector<2x256xf32>
      %c0_63 = arith.constant 0 : index
      %c0_64 = arith.constant 0 : index
      %95 = vector.load %arg7[%c0_63, %c0_64] : memref<1x256xf32, #tpu.memory_space<vmem>>, vector<1x256xf32>
      %96 = vector.broadcast %95 : vector<1x256xf32> to vector<2x256xf32>
      %97 = arith.addf %94, %96 : vector<2x256xf32>
      %cst_65 = arith.constant 0.000000e+00 : f32
      %98 = vector.broadcast %cst_65 : f32 to vector<2x256xf32>
      %99 = arith.cmpf oge, %97, %98 : vector<2x256xf32>
      %cst_66 = arith.constant 0.00999999977 : f32
      %100 = vector.broadcast %cst_66 : f32 to vector<2x256xf32>
      %101 = arith.mulf %100, %97 : vector<2x256xf32>
      %102 = arith.select %99, %97, %101 : vector<2x256xi1>, vector<2x256xf32>
      %103 = arith.truncf %102 : vector<2x256xf32> to vector<2x256xbf16>
      %c0_67 = arith.constant 0 : index
      %c0_68 = arith.constant 0 : index
      %104 = vector.load %arg8[%c0_67, %c0_68] : memref<256x128xbf16, #tpu.memory_space<vmem>>, vector<256x128xbf16>
      %cst_69 = arith.constant dense<0.000000e+00> : vector<2x128xf32>
      %105 = tpu.matmul %103, %104, %cst_69 {dimension_numbers = #tpu.dot_dimension_numbers<[1], [0], [0], [1], [0, 0, 1, 1], [], []>} : vector<2x256xbf16>, vector<256x128xbf16>, vector<2x128xf32> -> vector<2x128xf32>
      %c0_70 = arith.constant 0 : index
      %c0_71 = arith.constant 0 : index
      %106 = vector.load %arg9[%c0_70, %c0_71] : memref<1x128xf32, #tpu.memory_space<vmem>>, vector<1x128xf32>
      %107 = vector.broadcast %106 : vector<1x128xf32> to vector<2x128xf32>
      %108 = arith.addf %105, %107 : vector<2x128xf32>
      %cst_72 = arith.constant 0.000000e+00 : f32
      %109 = vector.broadcast %cst_72 : f32 to vector<2x128xf32>
      %110 = arith.cmpf oge, %108, %109 : vector<2x128xf32>
      %cst_73 = arith.constant 0.00999999977 : f32
      %111 = vector.broadcast %cst_73 : f32 to vector<2x128xf32>
      %112 = arith.mulf %111, %108 : vector<2x128xf32>
      %113 = arith.select %110, %108, %112 : vector<2x128xi1>, vector<2x128xf32>
      %114 = arith.truncf %113 : vector<2x128xf32> to vector<2x128xbf16>
      %c0_74 = arith.constant 0 : index
      %c0_75 = arith.constant 0 : index
      %115 = vector.load %arg10[%c0_74, %c0_75] : memref<128x10xbf16, #tpu.memory_space<vmem>>, vector<128x10xbf16>
      %cst_76 = arith.constant dense<0.000000e+00> : vector<2x10xf32>
      %116 = tpu.matmul %114, %115, %cst_76 {dimension_numbers = #tpu.dot_dimension_numbers<[1], [0], [0], [1], [0, 0, 1, 1], [], []>} : vector<2x128xbf16>, vector<128x10xbf16>, vector<2x10xf32> -> vector<2x10xf32>
      %c0_77 = arith.constant 0 : index
      %c0_78 = arith.constant 0 : index
      %117 = vector.load %arg11[%c0_77, %c0_78] : memref<1x10xf32, #tpu.memory_space<vmem>>, vector<1x10xf32>
      %118 = vector.broadcast %117 : vector<1x10xf32> to vector<2x10xf32>
      %119 = arith.addf %116, %118 : vector<2x10xf32>
      %cst_79 = arith.constant 0.000000e+00 : f32
      %120 = vector.broadcast %cst_79 : f32 to vector<2x10xf32>
      %121 = arith.cmpf oge, %119, %120 : vector<2x10xf32>
      %cst_80 = arith.constant 0.00999999977 : f32
      %122 = vector.broadcast %cst_80 : f32 to vector<2x10xf32>
      %123 = arith.mulf %122, %119 : vector<2x10xf32>
      %124 = arith.select %121, %119, %123 : vector<2x10xi1>, vector<2x10xf32>
      %c0_81 = arith.constant 0 : index
      %c0_82 = arith.constant 0 : index
      %125 = vector.load %arg12[%c0_81, %c0_82] : memref<2x10xf32, #tpu.memory_space<vmem>>, vector<2x10xf32>
      tpu.vector_store %arg12[%c0_81, %c0_82], %124 {strides = array<i32>} : memref<2x10xf32, #tpu.memory_space<vmem>>, vector<2x10xf32>,
    } else {
    }
    return
  }
  func.func @transform_0(%arg0: i32, %arg1: i32) -> (i32, i32, i32) {
    %c0_i32 = arith.constant 0 : i32
    %c0_i32_0 = arith.constant 0 : i32
    return %arg0, %c0_i32, %arg1 : i32, i32, i32
  }
  func.func @transform_1(%arg0: i32, %arg1: i32) -> (i32, i32) {
    %c0_i32 = arith.constant 0 : i32
    %c0_i32_0 = arith.constant 0 : i32
    %c0_i32_1 = arith.constant 0 : i32
    return %c0_i32, %c0_i32_0 : i32, i32
  }
  func.func @transform_2(%arg0: i32, %arg1: i32) -> (i32, i32) {
    %c0_i32 = arith.constant 0 : i32
    %c0_i32_0 = arith.constant 0 : i32
    %c0_i32_1 = arith.constant 0 : i32
    return %c0_i32, %c0_i32_0 : i32, i32
  }
  func.func @transform_3(%arg0: i32, %arg1: i32) -> (i32, i32) {
    %c0_i32 = arith.constant 0 : i32
    %c0_i32_0 = arith.constant 0 : i32
    %c0_i32_1 = arith.constant 0 : i32
    return %c0_i32, %c0_i32_0 : i32, i32
  }
  func.func @transform_4(%arg0: i32, %arg1: i32) -> (i32, i32) {
    %c0_i32 = arith.constant 0 : i32
    %c0_i32_0 = arith.constant 0 : i32
    %c0_i32_1 = arith.constant 0 : i32
    return %c0_i32, %c0_i32_0 : i32, i32
  }
  func.func @transform_5(%arg0: i32, %arg1: i32) -> (i32, i32) {
    %c0_i32 = arith.constant 0 : i32
    %c0_i32_0 = arith.constant 0 : i32
    %c0_i32_1 = arith.constant 0 : i32
    return %c0_i32, %c0_i32_0 : i32, i32
  }
  func.func @transform_6(%arg0: i32, %arg1: i32) -> (i32, i32) {
    %c0_i32 = arith.constant 0 : i32
    %c0_i32_0 = arith.constant 0 : i32
    %c0_i32_1 = arith.constant 0 : i32
    return %c0_i32, %c0_i32_0 : i32, i32
  }
  func.func @transform_7(%arg0: i32, %arg1: i32) -> (i32, i32) {
    %c0_i32 = arith.constant 0 : i32
    %c0_i32_0 = arith.constant 0 : i32
    %c0_i32_1 = arith.constant 0 : i32
    return %c0_i32, %c0_i32_0 : i32, i32
  }
  func.func @transform_8(%arg0: i32, %arg1: i32) -> (i32, i32) {
    %c0_i32 = arith.constant 0 : i32
    %c0_i32_0 = arith.constant 0 : i32
    %c0_i32_1 = arith.constant 0 : i32
    return %c0_i32, %c0_i32_0 : i32, i32
  }
  func.func @transform_9(%arg0: i32, %arg1: i32) -> (i32, i32) {
    %c0_i32 = arith.constant 0 : i32
    %c0_i32_0 = arith.constant 0 : i32
    %c0_i32_1 = arith.constant 0 : i32
    return %c0_i32, %c0_i32_0 : i32, i32
  }
  func.func @transform_10(%arg0: i32, %arg1: i32) -> (i32, i32) {
    %c0_i32 = arith.constant 0 : i32
    %c0_i32_0 = arith.constant 0 : i32
    return %arg0, %c0_i32 : i32, i32
  }
  func.func @transform_11(%arg0: i32, %arg1: i32) -> (i32, i32, i32) {
    %c0_i32 = arith.constant 0 : i32
    %c0_i32_0 = arith.constant 0 : i32
    %c0_i32_1 = arith.constant 0 : i32
    return %arg0, %c0_i32, %c0_i32_0 : i32, i32, i32
  }
}

</mosaic_0001>

<bundles_post_ra>
// kernel: tcnn_forward.1
= control target key start
LH: loop header
LB: loop body
LE: loop exit
PB: predicated region body
PF: predicated region fallthrough
CT: control target
= control target key end

     0   :  { %17 = vsyncpa [#allocation5], 0  ;;  %s2919_s0 = inlined_call_operand.vmem [shape: f32[2,60,64], index: 0, kind: input, shape index: {}]   ;;  %s2920_s1 = inlined_call_operand.vmem [shape: f32[60,512], index: 1, kind: input, shape index: {}]   ;;  %s2921_s2 = inlined_call_operand.hbm [shape: f32[60,512], index: 2, kind: input, shape index: {}]   ;;  %s2922_s3 = inlined_call_operand.vmem [shape: f32[1,512], index: 3, kind: input, shape index: {}]   ;;  %s2923_s4 = inlined_call_operand.hbm [shape: bf16[512,256], index: 4, kind: input, shape index: {}]   ;;  %s2924_s5 = inlined_call_operand.vmem [shape: f32[1,256], index: 5, kind: input, shape index: {}]   ;;  %s2925_s6 = inlined_call_operand.hbm [shape: bf16[256,128], index: 6, kind: input, shape index: {}]   ;;  %s2926_s7 = inlined_call_operand.vmem [shape: f32[1,128], index: 7, kind: input, shape index: {}]   ;;  %s2927_s8 = inlined_call_operand.vmem [shape: bf16[128,10], index: 8, kind: input, shape index: {}]   ;;  %s2928_s9 = inlined_call_operand.vmem [shape: f32[1,10], index: 9, kind: input, shape index: {}]   ;;  %s2929_s10 = inlined_call_operand.hbm [shape: f32[2,10], index: 10, kind: output, shape index: {0}]   ;;  %s2930_s11 = inlined_call_operand.vmem [shape: f32[2,9,60], index: 11, kind: output, shape index: {1}]  }
   0x1   :  { %18 = vsyncpa [#allocation8], 0 }
   0x2   :  { %19 = vsyncpa [#allocation6], 0  ;;  %s2286_s17 = smov [#allocation7]  }
   0x3   :  { %s43_s18 = sshll.u32 %s2286_s17, 4  ;;  %s44_s18 = int_to_ptr.vmem [resolvable:$true] %s43_s18 }
   0x4   :  { %s2208_s19 = scalar_lea.vmem %s44_s18, 8192  ;;  %p2213_p1 = scmp.lt.s32.totalorder %s44_s18, %s44_s18 }
   0x5   :  { %p2209_p0 = scmp.ne.s32.totalorder %s44_s18, %s2208_s19  ;;  %p2214_p2 = scmp.lt.s32.totalorder %s2208_s19, %s2208_s19 }
   0x7   :  { %p2215_p3 = por %p2214_p2, %p2213_p1 }
   0x9   :  { %p2216_p4 = pnand %p2215_p3, %p2209_p0 }
   0xb   :  { %2219 = shalt.err (!%p2216_p4)
}
   0xc   :  { %s2287_s20 = smov 128   ;;  %s2288_s21 = smov 8  }
   0xd   :  { %49 = dma.hbm_to_vmem [thread:$0]  %s2923_s4, 8192, %s44_s18, [#allocation8], %s2287_s20, %s2287_s20, %s2288_s21  }
   0xe   :  { %s2289_s24 = smov [#allocation4]  }
   0xf   :  { %s29_s25 = sshll.u32 %s2289_s24, 4  ;;  %s30_s25 = int_to_ptr.vmem [resolvable:$true] %s29_s25 }
  0x10   :  { %s2228_s26 = scalar_lea.vmem %s30_s25, 4096  ;;  %p2233_p6 = scmp.lt.s32.totalorder %s30_s25, %s30_s25 }
  0x11   :  { %p2229_p5 = scmp.ne.s32.totalorder %s30_s25, %s2228_s26  ;;  %p2234_p7 = scmp.lt.s32.totalorder %s2228_s26, %s2228_s26 }
  0x13   :  { %p2235_p8 = por %p2234_p7, %p2233_p6 }
  0x15   :  { %p2236_p9 = pnand %p2235_p8, %p2229_p5 }
  0x17   :  { %2239 = shalt.err (!%p2236_p9)
}
  0x18   :  { %s2290_s27 = smov 512   ;;  %s2291_s28 = smov 32  }
  0x19   :  { %35 = dma.hbm_to_vmem [thread:$0]  %s2921_s2, 4096, %s30_s25, [#allocation5], %s2290_s27, %s2290_s27, %s2291_s28  }
  0x1a   :  { %s2292_s12 = smov [#allocation9]  }
  0x1b   :  { %s57_s13 = sshll.u32 %s2292_s12, 4  ;;  %s58_s13 = int_to_ptr.vmem [resolvable:$true] %s57_s13 }
  0x1c   :  { %s2248_s4 = scalar_lea.vmem %s58_s13, 2048  ;;  %p2253_p11 = scmp.lt.s32.totalorder %s58_s13, %s58_s13 }
  0x1d   :  { %p2249_p10 = scmp.ne.s32.totalorder %s58_s13, %s2248_s4  ;;  %p2254_p12 = scmp.lt.s32.totalorder %s2248_s4, %s2248_s4 }
  0x1f   :  { %p2255_p13 = por %p2254_p12, %p2253_p11 }
  0x21   :  { %p2256_p0 = pnand %p2255_p13, %p2249_p10 }
  0x23   :  { %2259 = shalt.err (!%p2256_p0)
}
  0x24   :  { %s2293_s14 = smov 64   ;;  %s2294_s15 = smov 4  }
  0x25   :  { %63 = dma.hbm_to_vmem [thread:$0]  %s2925_s6, 2048, %s58_s13, [#allocation8], %s2293_s14, %s2293_s14, %s2294_s15  }
  0x26   :  { %2280 = dma.done.wait [#allocation5], 4096  }
  0x27   :  { %2281 = vsyncadd [#allocation5], 4294963200 }
  0x28   :  { %2282 = dma.done.wait [#allocation8], 10240  }
  0x29   :  { %2283 = vsyncadd [#allocation8], 4294957056  ;;  %v2371_v0 = vld [vmem:[%s2919_s0 + $0x40] sm:$0xff]  ;;  %vm120_vm0 = vcmask 523264   ;;  %v2381_v2 = vld [vmem:[%s2919_s0 + $0x48] sm:$0xff]  ;;  %vm142_vm1 = vcmask 519168  }
  0x2a   :  { %v2376_v1 = vld [vmem:[%s2919_s0] sm:$0xff]  ;;  %v295_v3 = vmin.f32 %v2371_v0, 0.0  ;;  %v296_v5 = vmin.f32 %v2381_v2, 0.0  ;;  %v2389_v6 = vld [vmem:[%s2919_s0 + $0x8] sm:$0xff]  ;;  %v2395_v8 = vld [vmem:[%s2919_s0 + $0x50] sm:$0xff]  ;;  %v113_v50 = vmax.f32 %v2381_v2, 0.0 }
  0x2b   :  { %v287_v4 = vmin.f32 %v2376_v1, 0.0  ;;  %v288_v7 = vmin.f32 %v2389_v6, 0.0  ;;  %v2400_v9 = vld [vmem:[%s2919_s0 + $0x10] sm:$0xff]  ;;  %v297_v14 = vmin.f32 %v2395_v8, 0.0  ;;  %v2411_v16 = vld [vmem:[%s2919_s0 + $0x58] sm:$0xff]  ;;  %v2421_v18 = vld [vmem:[%s2919_s0 + $0x60] sm:$0xff] }
  0x2c   :  { %v327_v10 = vsel %vm120_vm0, %v295_v3, 0.0  ;;  %v330_v12 = vsel %vm120_vm0, %v296_v5, 0.0  ;;  %v289_v15 = vmin.f32 %v2400_v9, 0.0  ;;  %v2416_v17 = vld [vmem:[%s2919_s0 + $0x18] sm:$0xff]  ;;  %v298_v21 = vmin.f32 %v2411_v16, 0.0  ;;  %v2430_v23 = vld [vmem:[%s2919_s0 + $0x20] sm:$0xff] }
  0x2d   :  { %v303_v11 = vsel %vm120_vm0, %v287_v4, 0.0  ;;  %328 = vadd.xlane.f32.xlu1 %v327_v10  ;;  %v306_v13 = vsel %vm120_vm0, %v288_v7, 0.0  ;;  %v333_v19 = vsel %vm120_vm0, %v297_v14, 0.0  ;;  %v290_v22 = vmin.f32 %v2416_v17, 0.0  ;;  %v2435_v24 = vld [vmem:[%s2919_s0 + $0x68] sm:$0xff]  ;;  %v2449_v30 = vld [vmem:[%s2919_s0 + $0x70] sm:$0xff] }
  0x2e   :  { %304 = vadd.xlane.f32.xlu0 %v303_v11  ;;  %v309_v20 = vsel %vm120_vm0, %v289_v15, 0.0  ;;  %v336_v25 = vsel %vm120_vm0, %v298_v21, 0.0  ;;  %v299_v27 = vmin.f32 %v2421_v18, 0.0  ;;  %v291_v28 = vmin.f32 %v2430_v23, 0.0  ;;  %v2444_v29 = vld [vmem:[%s2919_s0 + $0x28] sm:$0xff]  ;;  %v2455_v32 = vld [vmem:[%s2919_s0 + $0x30] sm:$0xff] }
  0x2f   :  { %v312_v26 = vsel %vm120_vm0, %v290_v22, 0.0  ;;  %v300_v31 = vmin.f32 %v2435_v24, 0.0  ;;  %v292_v35 = vmin.f32 %v2444_v29, 0.0  ;;  %v2463_v36 = vld [vmem:[%s2919_s0 + $0x78] sm:$0xf]  ;;  %v301_v37 = vmin.f32 %v2449_v30, 0.0 }
  0x30   :  { %v339_v33 = vsel %vm120_vm0, %v299_v27, 0.0  ;;  %v315_v34 = vsel %vm120_vm0, %v291_v28, 0.0  ;;  %v2469_v38 = vld [vmem:[%s2919_s0 + $0x38] sm:$0xf]  ;;  %v293_v41 = vmin.f32 %v2455_v32, 0.0  ;;  %v302_v42 = vmin.f32 %v2463_v36, 0.0 }
  0x31   :  { %331 = vadd.xlane.f32.xlu1 %v330_v12  ;;  %v342_v39 = vsel %vm120_vm0, %v300_v31, 0.0  ;;  %v318_v40 = vsel %vm120_vm0, %v292_v35, 0.0  ;;  %v345_v43 = vsel %vm120_vm0, %v301_v37, 0.0  ;;  %v294_v45 = vmin.f32 %v2469_v38, 0.0  ;;  %v752_v63 = vld [vmem:[#allocation4 + $0xe8] sm:$0xf] }
  0x32   :  { %307 = vadd.xlane.f32.xlu0 %v306_v13  ;;  %v321_v44 = vsel %vm120_vm0, %v293_v41, 0.0  ;;  %v105_v46 = vmax.f32 %v2389_v6, 0.0  ;;  %v104_v47 = vmax.f32 %v2376_v1, 0.0  ;;  %v348_v48 = vsel %vm142_vm1, %v302_v42, 0.0  ;;  %v751_v1 = vld [vmem:[#allocation4 + $0xe0] sm:$0xf] }
  0x33   :  { %v324_v49 = vsel %vm142_vm1, %v294_v45, 0.0  ;;  %v112_v51 = vmax.f32 %v2371_v0, 0.0  ;;  %v114_v54 = vmax.f32 %v2395_v8, 0.0  ;;  %v106_v55 = vmax.f32 %v2400_v9, 0.0  ;;  %v754_v0 = vld [vmem:[#allocation4 + $0xf8] sm:$0xf] }
  0x34   :  { %v124_v52 = vsel %vm120_vm0, %v105_v46, 0.0  ;;  %v121_v53 = vsel %vm120_vm0, %v104_v47, 0.0  ;;  %v149_v56 = vsel %vm120_vm0, %v113_v50, 0.0  ;;  %vm84_vm2 = vcmask 484352   ;;  %v753_v2 = vld [vmem:[#allocation4 + $0xf0] sm:$0xf] }
  0x35   :  { %334 = vadd.xlane.f32.xlu1 %v333_v19  ;;  %v146_v57 = vsel %vm120_vm0, %v112_v51, 0.0  ;;  %v152_v58 = vsel %vm120_vm0, %v114_v54, 0.0  ;;  %v115_v59 = vmax.f32 %v2411_v16, 0.0  ;;  %v2295_v60 = vmov 0.0   ;;  %v748_v7 = vld [vmem:[#allocation4 + $0xc8] sm:$0xff]  ;;  %v750_v8 = vld [vmem:[#allocation4 + $0xd8] sm:$0xff] }
  0x36   :  { %310 = vadd.xlane.f32.xlu0 %v309_v20  ;;  %86 = vst.msk [vmem:[#allocation3] sm:$0x3] %vm84_vm2, %v2295_v60  ;;  %85 = vst.msk [vmem:[#allocation2] sm:$0x3] %vm84_vm2, %v2295_v60  ;;  %836 = vmatprep.mubr.f32.mxu0 %v2295_v60  ;;  %v127_v61 = vsel %vm120_vm0, %v106_v55, 0.0  ;;  %v107_v62 = vmax.f32 %v2416_v17, 0.0  ;;  %v186_v55 = vlaneseq }
  0x37   :  { %907 = vmatprep.mubr.f32.mxu1 %v2295_v60  ;;  %vm759_vm3 = vcmask 1043456   ;;  %v155_v3 = vsel %vm120_vm0, %v115_v59, 0.0  ;;  %v116_v5 = vmax.f32 %v2421_v18, 0.0  ;;  %v108_v6 = vmax.f32 %v2430_v23, 0.0  ;;  %v747_v9 = vld [vmem:[#allocation4 + $0xc0] sm:$0xff]  ;;  %v749_v10 = vld [vmem:[#allocation4 + $0xd0] sm:$0xff] }
  0x38   :  { %v130_v4 = vsel %vm120_vm0, %v107_v62, 0.0  ;;  %1914 = vmatprep.subr.msk.mxu0 %vm759_vm3, %v752_v63  ;;  %1917 = vmatprep.subr.msk.mxu1 %vm759_vm3, %v754_v0  ;;  %v744_v11 = vld [vmem:[#allocation4 + $0xa8] sm:$0xff]  ;;  %v746_v12 = vld [vmem:[#allocation4 + $0xb8] sm:$0xff]  ;;  %v743_v13 = vld [vmem:[#allocation4 + $0xa0] sm:$0xff]  ;;  %v117_v17 = vmax.f32 %v2435_v24, 0.0  ;;  %v109_v18 = vmax.f32 %v2444_v29, 0.0 }
  0x39   :  { %337 = vadd.xlane.f32.xlu1 %v336_v25  ;;  %1915 = vmatpush1.msk.msra.mxu0 %vm759_vm3, %v751_v1  ;;  %v745_v14 = vld [vmem:[#allocation4 + $0xb0] sm:$0xff]  ;;  %v158_v15 = vsel %vm120_vm0, %v116_v5, 0.0  ;;  %v133_v16 = vsel %vm120_vm0, %v108_v6, 0.0  ;;  %v740_v19 = vld [vmem:[#allocation4 + $0x88] sm:$0xff]  ;;  %v742_v20 = vld [vmem:[#allocation4 + $0x98] sm:$0xff]  ;;  %v118_v23 = vmax.f32 %v2449_v30, 0.0 }
  0x3a   :  { %313 = vadd.xlane.f32.xlu0 %v312_v26  ;;  %1918 = vmatpush1.msk.msra.mxu1 %vm759_vm3, %v753_v2  ;;  %v739_v21 = vld [vmem:[#allocation4 + $0x80] sm:$0xff]  ;;  %v741_v22 = vld [vmem:[#allocation4 + $0x90] sm:$0xff]  ;;  %v736_v25 = vld [vmem:[#allocation4 + $0x68] sm:$0xff]  ;;  %v161_v24 = vsel %vm120_vm0, %v117_v17, 0.0  ;;  %v136_v27 = vsel %vm120_vm0, %v109_v18, 0.0  ;;  %v110_v28 = vmax.f32 %v2455_v32, 0.0 }
  0x3b   :  { %790 = vmatprep.subr.mxu0 %v748_v7  ;;  %861 = vmatprep.subr.mxu1 %v750_v8  ;;  %v738_v26 = vld [vmem:[#allocation4 + $0x78] sm:$0xff]  ;;  %v735_v29 = vld [vmem:[#allocation4 + $0x60] sm:$0xff]  ;;  %v119_v31 = vmax.f32 %v2463_v36, 0.0  ;;  %v111_v35 = vmax.f32 %v2469_v38, 0.0  ;;  %v164_v32 = vsel %vm120_vm0, %v118_v23, 0.0  ;;  %v729_v38 = vld [vmem:[#allocation4 + $0x30] sm:$0xff] }
  0x3c   :  { %791 = vmatpush1.msra.mxu0 %v747_v9  ;;  %862 = vmatpush1.msra.mxu1 %v749_v10  ;;  %v734_v30 = vld [vmem:[#allocation4 + $0x58] sm:$0xff]  ;;  %v731_v37 = vld [vmem:[#allocation4 + $0x40] sm:$0xff]  ;;  %v139_v41 = vsel %vm120_vm0, %v110_v28, 0.0  ;;  %v722_v50 = vld [vmem:[%s2920_s1 + $0xf8] sm:$0xf]  ;;  %v2530_v0 = vshrl.u32 %v186_v55, 7 }
  0x3d   :  { %340 = vadd.xlane.f32.xlu1 %v339_v33  ;;  %792 = vmatprep.subr.mxu0 %v744_v11  ;;  %v737_v33 = vld [vmem:[#allocation4 + $0x70] sm:$0xff]  ;;  %v730_v36 = vld [vmem:[#allocation4 + $0x38] sm:$0xff]  ;;  %v727_v42 = vld [vmem:[#allocation4 + $0x20] sm:$0xff]  ;;  %v143_v45 = vsel %vm142_vm1, %v111_v35, 0.0  ;;  %vm197_vm4 = vcmask 130112   ;;  %vm204_vm5 = vcmask 195712  }
  0x3e   :  { %316 = vadd.xlane.f32.xlu0 %v315_v34  ;;  %863 = vmatprep.subr.mxu1 %v746_v12  ;;  %v732_v34 = vld [vmem:[#allocation4 + $0x48] sm:$0xff]  ;;  %v726_v46 = vld [vmem:[#allocation4 + $0x18] sm:$0xff]  ;;  %v723_v47 = vld [vmem:[#allocation4] sm:$0xff]  ;;  %vm211_vm6 = vcmask 261312   ;;  %vm218_vm7 = vcmask 326912   ;;  %vm225_vm8 = vcmask 392512  }
  0x3f   :  { %793 = vmatpush1.msra.mxu0 %v743_v13  ;;  %864 = vmatpush1.msra.mxu1 %v745_v14  ;;  %vm232_vm9 = vcmask 458112   ;;  %vm239_vm10 = vcmask 523712   ;;  %vm280_vm11 = vcmask 1041409   ;;  %vm755_vm12 = vcmask 490496   ;;  %s2298_s27 = smov [#allocation10]  }
  0x40   :  { %794 = vmatprep.subr.mxu0 %v740_v19  ;;  %865 = vmatprep.subr.mxu1 %v742_v20  ;;  %vm483_vm13 = vcmask 483328   ;;  %s1900_s28 = sshll.u32 %s2298_s27, 4  ;;  %s1901_s28 = int_to_ptr.vmem [resolvable:$true] %s1900_s28 }
  0x41   :  { %343 = vadd.xlane.f32.xlu1 %v342_v39  ;;  %795 = vmatpush1.msra.mxu0 %v739_v21  ;;  %v733_v39 = vld [vmem:[#allocation4 + $0x50] sm:$0xff]  ;;  %p2265_p2 = scmp.lt.s32.totalorder %s1901_s28, %s1901_s28 }
  0x42   :  { %319 = vadd.xlane.f32.xlu0 %v318_v40  ;;  %866 = vmatpush1.msra.mxu1 %v741_v22  ;;  %v728_v40 = vld [vmem:[#allocation4 + $0x28] sm:$0xff] }
  0x43   :  { %796 = vmatprep.subr.mxu0 %v736_v25  ;;  %867 = vmatprep.subr.mxu1 %v738_v26 }
  0x44   :  { %797 = vmatpush1.msra.mxu0 %v735_v29  ;;  %868 = vmatpush1.msra.mxu1 %v737_v33 }
  0x45   :  { %346 = vadd.xlane.f32.xlu1 %v345_v43  ;;  %v167_v43 = vsel %vm142_vm1, %v119_v31, 0.0  ;;  %798 = vmatprep.subr.mxu0 %v732_v34 }
  0x46   :  { %322 = vadd.xlane.f32.xlu0 %v321_v44  ;;  %869 = vmatprep.subr.mxu1 %v734_v30  ;;  %v724_v44 = vld [vmem:[#allocation4 + $0x8] sm:$0xff] }
  0x47   :  { %799 = vmatpush1.msra.mxu0 %v731_v37  ;;  %870 = vmatpush1.msra.mxu1 %v733_v39 }
  0x48   :  { %800 = vmatprep.subr.mxu0 %v728_v40  ;;  %871 = vmatprep.subr.mxu1 %v730_v36 }
  0x49   :  { %349 = vadd.xlane.f32.xlu1 %v348_v48  ;;  %801 = vmatpush1.msra.mxu0 %v727_v42  ;;  %v725_v48 = vld [vmem:[#allocation4 + $0x10] sm:$0xff] }
  0x4a   :  { %325 = vadd.xlane.f32.xlu0 %v324_v49  ;;  %872 = vmatpush1.msra.mxu1 %v729_v38  ;;  %v720_v49 = vld [vmem:[%s2920_s1 + $0xe8] sm:$0xf] }
  0x4b   :  { %802 = vmatprep.subr.mxu0 %v724_v44  ;;  %873 = vmatprep.subr.mxu1 %v726_v46 }
  0x4c   :  { %803 = vmatpush1.msra.mxu0 %v723_v47  ;;  %874 = vmatpush1.msra.mxu1 %v725_v48 }
  0x4d   :  { %125 = vadd.xlane.f32.xlu1 %v124_v52  ;;  %1920 = vmatprep.subr.msk.mxu0 %vm759_vm3, %v720_v49 }
  0x4e   :  { %122 = vadd.xlane.f32.xlu0 %v121_v53  ;;  %1923 = vmatprep.subr.msk.mxu1 %vm759_vm3, %v722_v50  ;;  %v286_v50 = vld [vmem:[#allocation3] sm:$0x3] }
  0x51   :  { %150 = vadd.xlane.f32.xlu1 %v149_v56 }
  0x52   :  { %147 = vadd.xlane.f32.xlu0 %v146_v57 }
  0x55   :  { %153 = vadd.xlane.f32.xlu1 %v152_v58  ;;  %v187_v58 = vand.u32 127, %v186_v55 }
  0x56   :  { %128 = vadd.xlane.f32.xlu0 %v127_v61 }
  0x57   :  { %v192_v62 = vadd.s32 4294967288, %v187_v58  ;;  %v199_v63 = vadd.s32 4294967280, %v187_v58  ;;  %v206_v1 = vadd.s32 4294967272, %v187_v58  ;;  %v213_v2 = vadd.s32 4294967264, %v187_v58 }
  0x58   :  { %v220_v6 = vadd.s32 4294967256, %v187_v58  ;;  %v227_v8 = vadd.s32 4294967248, %v187_v58  ;;  %v2539_v9 = vsub.s32 %v187_v58, %v2530_v0  ;;  %v234_v14 = vadd.s32 4294967240, %v187_v58 }
  0x59   :  { %156 = vadd.xlane.f32.xlu1 %v155_v3  ;;  %v2533_v5 = vsub.s32 %v192_v62, %v2530_v0  ;;  %v2536_v7 = vsub.s32 %v199_v63, %v2530_v0  ;;  %v2542_v10 = vsub.s32 %v206_v1, %v2530_v0  ;;  %v2545_v11 = vsub.s32 %v213_v2, %v2530_v0  ;;  %v719_v1 = vld [vmem:[%s2920_s1 + $0xe0] sm:$0xf]  ;;  %v721_v2 = vld [vmem:[%s2920_s1 + $0xf0] sm:$0xf] }
  0x5a   :  { %131 = vadd.xlane.f32.xlu0 %v130_v4  ;;  %v2550_v17 = vsub.s32 %v220_v6, %v2530_v0  ;;  %v2555_v20 = vsub.s32 %v227_v8, %v2530_v0  ;;  %v2564_v29 = vsub.s32 %v234_v14, %v2530_v0  ;;  %v716_v6 = vld [vmem:[%s2920_s1 + $0xc8] sm:$0xff]  ;;  %v718_v8 = vld [vmem:[%s2920_s1 + $0xd8] sm:$0xff] }
  0x5b   :  { %v712_v14 = vld [vmem:[%s2920_s1 + $0xa8] sm:$0xff] }
  0x5d   :  { %159 = vadd.xlane.f32.xlu1 %v158_v15 }
  0x5e   :  { %134 = vadd.xlane.f32.xlu0 %v133_v16 }
  0x61   :  { %162 = vadd.xlane.f32.xlu1 %v161_v24 }
  0x62   :  { %137 = vadd.xlane.f32.xlu0 %v136_v27 }
  0x65   :  { %165 = vadd.xlane.f32.xlu1 %v164_v32 }
  0x66   :  { %140 = vadd.xlane.f32.xlu0 %v139_v41 }
  0x69   :  { %168 = vadd.xlane.f32.xlu1 %v167_v43 }
  0x6a   :  { %144 = vadd.xlane.f32.xlu0 %v143_v45 }
  0xb6   :  { %v329_v51 = vpop.xlane.xlu1 %328 }
  0xb7   :  { %v305_v52 = vpop.xlane.xlu0 %304  ;;  %v409_v21 = vrot.slane %v329_v51, %v2539_v9 }
  0xb8   :  { %v370_v22 = vrot.slane %v305_v52, %v2539_v9 }
  0xba   :  { %v332_v53 = vpop.xlane.xlu1 %331 }
  0xbb   :  { %v308_v54 = vpop.xlane.xlu0 %307  ;;  %v413_v15 = vrot.slane %v332_v53, %v2533_v5 }
  0xbc   :  { %v374_v16 = vrot.slane %v308_v54, %v2533_v5 }
  0xbd   :  { %v414_v31 = vsel %vm197_vm4, %v413_v15, %v409_v21  ;;  %v714_v15 = vld [vmem:[%s2920_s1 + $0xb8] sm:$0xff] }
  0xbe   :  { %v335_v56 = vpop.xlane.xlu1 %334  ;;  %v375_v33 = vsel %vm197_vm4, %v374_v16, %v370_v22  ;;  %v711_v16 = vld [vmem:[%s2920_s1 + $0xa0] sm:$0xff]  ;;  %v708_v22 = vld [vmem:[%s2920_s1 + $0x88] sm:$0xff] }
  0xbf   :  { %v311_v57 = vpop.xlane.xlu0 %310  ;;  %v418_v18 = vrot.slane %v335_v56, %v2536_v7 }
  0xc0   :  { %v379_v19 = vrot.slane %v311_v57, %v2536_v7 }
  0xc1   :  { %v419_v30 = vsel %vm204_vm5, %v418_v18, %v414_v31  ;;  %v713_v18 = vld [vmem:[%s2920_s1 + $0xb0] sm:$0xff] }
  0xc2   :  { %v338_v59 = vpop.xlane.xlu1 %337  ;;  %v380_v37 = vsel %vm204_vm5, %v379_v19, %v375_v33  ;;  %v703_v33 = vld [vmem:[%s2920_s1 + $0x60] sm:$0xff] }
  0xc3   :  { %v314_v61 = vpop.xlane.xlu0 %313  ;;  %v423_v23 = vrot.slane %v338_v59, %v2542_v10 }
  0xc4   :  { %v384_v25 = vrot.slane %v314_v61, %v2542_v10 }
  0xc5   :  { %v424_v32 = vsel %vm211_vm6, %v423_v23, %v419_v30  ;;  %v710_v23 = vld [vmem:[%s2920_s1 + $0x98] sm:$0xff] }
  0xc6   :  { %v341_v3 = vpop.xlane.xlu1 %340  ;;  %v385_v41 = vsel %vm211_vm6, %v384_v25, %v380_v37  ;;  %v707_v25 = vld [vmem:[%s2920_s1 + $0x80] sm:$0xff] }
  0xc7   :  { %v317_v4 = vpop.xlane.xlu0 %316  ;;  %v428_v26 = vrot.slane %v341_v3, %v2545_v11 }
  0xc8   :  { %v389_v24 = vrot.slane %v317_v4, %v2545_v11 }
  0xc9   :  { %v429_v36 = vsel %vm218_vm7, %v428_v26, %v424_v32  ;;  %v709_v26 = vld [vmem:[%s2920_s1 + $0x90] sm:$0xff]  ;;  %v702_v32 = vld [vmem:[%s2920_s1 + $0x58] sm:$0xff] }
  0xca   :  { %v344_v12 = vpop.xlane.xlu1 %343  ;;  %v390_v42 = vsel %vm218_vm7, %v389_v24, %v385_v41  ;;  %v704_v24 = vld [vmem:[%s2920_s1 + $0x68] sm:$0xff] }
  0xcb   :  { %v320_v13 = vpop.xlane.xlu0 %319  ;;  %v433_v34 = vrot.slane %v344_v12, %v2550_v17  ;;  %v715_v12 = vld [vmem:[%s2920_s1 + $0xc0] sm:$0xff] }
  0xcc   :  { %v394_v35 = vrot.slane %v320_v13, %v2550_v17  ;;  %v717_v13 = vld [vmem:[%s2920_s1 + $0xd0] sm:$0xff] }
  0xcd   :  { %v434_v44 = vsel %vm225_vm8, %v433_v34, %v429_v36  ;;  %v705_v34 = vld [vmem:[%s2920_s1 + $0x70] sm:$0xff] }
  0xce   :  { %v347_v27 = vpop.xlane.xlu1 %346  ;;  %v395_v45 = vsel %vm225_vm8, %v394_v35, %v390_v42  ;;  %v701_v36 = vld [vmem:[%s2920_s1 + $0x50] sm:$0xff] }
  0xcf   :  { %v323_v28 = vpop.xlane.xlu0 %322  ;;  %v438_v39 = vrot.slane %v347_v27, %v2555_v20  ;;  %v706_v27 = vld [vmem:[%s2920_s1 + $0x78] sm:$0xff] }
  0xd0   :  { %v399_v40 = vrot.slane %v323_v28, %v2555_v20 }
  0xd1   :  { %v439_v48 = vsel %vm232_vm9, %v438_v39, %v434_v44 }
  0xd2   :  { %v350_v43 = vpop.xlane.xlu1 %349  ;;  %v400_v49 = vsel %vm232_vm9, %v399_v40, %v395_v45  ;;  %v700_v40 = vld [vmem:[%s2920_s1 + $0x48] sm:$0xff] }
  0xd3   :  { %v326_v38 = vpop.xlane.xlu0 %325  ;;  %v443_v46 = vrot.slane %v350_v43, %v2564_v29  ;;  %v696_v43 = vld [vmem:[%s2920_s1 + $0x28] sm:$0xff] }
  0xd4   :  { %v404_v47 = vrot.slane %v326_v38, %v2564_v29 }
  0xd5   :  { %v444_v51 = vsel %vm239_vm10, %v443_v46, %v439_v48  ;;  %v695_v46 = vld [vmem:[%s2920_s1 + $0x20] sm:$0xff] }
  0xd6   :  { %v405_v52 = vsel %vm239_vm10, %v404_v47, %v400_v49  ;;  %v2587_v54 = vpop.xlane.xlu1 %125  ;;  %v697_v47 = vld [vmem:[%s2920_s1 + $0x30] sm:$0xff] }
  0xd7   :  { %v445_v53 = vsel %vm280_vm11, %v444_v51, %v405_v52  ;;  %v2589_v55 = vpop.xlane.xlu0 %122  ;;  %v196_v28 = vrot.slane %v2587_v54, %v2533_v5  ;;  %v692_v52 = vld [vmem:[%s2920_s1 + $0x8] sm:$0xff] }
  0xd8   :  { %v447_v56 = vadd.f32 %v445_v53, %v286_v50  ;;  %v191_v31 = vrot.slane %v2589_v55, %v2539_v9  ;;  %v694_v53 = vld [vmem:[%s2920_s1 + $0x18] sm:$0xff] }
  0xda   :  { %448 = vst.msk [vmem:[#allocation3] sm:$0x3] %vm84_vm2, %v447_v56  ;;  %v2592_v57 = vpop.xlane.xlu1 %150  ;;  %v198_v38 = vsel %vm197_vm4, %v196_v28, %v191_v31  ;;  %v691_v56 = vld [vmem:[%s2920_s1] sm:$0xff] }
  0xdb   :  { %v2594_v58 = vpop.xlane.xlu0 %147  ;;  %v248_v35 = vrot.slane %v2592_v57, %v2533_v5 }
  0xdc   :  { %v244_v30 = vrot.slane %v2594_v58, %v2539_v9  ;;  %v699_v9 = vld [vmem:[%s2920_s1 + $0x40] sm:$0xff] }
  0xde   :  { %v2596_v59 = vpop.xlane.xlu1 %153  ;;  %v249_v48 = vsel %vm197_vm4, %v248_v35, %v244_v30  ;;  %vm2297_vm4 = vmmov 0  }
  0xdf   :  { %v2598_v61 = vpop.xlane.xlu0 %128  ;;  %v253_v41 = vrot.slane %v2596_v59, %v2536_v7 }
  0xe0   :  { %v203_v5 = vrot.slane %v2598_v61, %v2536_v7  ;;  %v698_v7 = vld [vmem:[%s2920_s1 + $0x38] sm:$0xff]  ;;  %v693_v61 = vld [vmem:[%s2920_s1 + $0x10] sm:$0xff] }
  0xe1   :  { %v454_v62 = vld [vmem:[#allocation3] sm:$0x3]  ;;  %v254_v54 = vsel %vm204_vm5, %v253_v41, %v249_v48 }
  0xe2   :  { %v2600_v63 = vmul.f32 0.015625, %v454_v62  ;;  %v2608_v3 = vpop.xlane.xlu1 %156  ;;  %v205_v55 = vsel %vm204_vm5, %v203_v5, %v198_v38  ;;  %v2082_v62 = vld [vmem:[#allocation7 + $0x74] ss:$8 sps:$4 sm:$0xff]  }
  0xe3   :  { %v2610_v4 = vpop.xlane.xlu0 %131  ;;  %v258_v42 = vrot.slane %v2608_v3, %v2542_v10 }
  0xe4   :  { %1916 = vmatmul.mubr.msk.f32.vlgmr.msra.gmra.mxu0 %vm755_vm12, %v2600_v63  ;;  %1919 = vmatmul.mubr.msk.f32.vlgmr.msra.gmra.mxu1 %vm755_vm12, %v2600_v63  ;;  %v210_v44 = vrot.slane %v2610_v4, %v2542_v10  ;;  %v488_v28 = vmul.f32 1e-06, %v2600_v63  ;;  %v517_v31 = vmul.f32 1e-08, %v2600_v63  ;;  %v546_v35 = vmul.f32 1e-10, %v2600_v63 }
  0xe5   :  { %1921 = vmatpush1.msk.msra.mxu0 %vm759_vm3, %v719_v1  ;;  %1924 = vmatpush1.msk.msra.mxu1 %vm759_vm3, %v721_v2  ;;  %v259_v57 = vsel %vm211_vm6, %v258_v42, %v254_v54  ;;  %v575_v30 = vmul.f32 1e-12, %v2600_v63  ;;  %v2088_v42 = vld [vmem:[#allocation7 + $0x64] ss:$8 sps:$4 sm:$0xff]  }
  0xe6   :  { %947 = vmatprep.subr.mxu0 %v716_v6  ;;  %1018 = vmatprep.subr.mxu1 %v718_v8  ;;  %v2642_v19 = vpop.xlane.xlu1 %159  ;;  %v212_v1 = vsel %vm211_vm6, %v210_v44, %v205_v55 }
  0xe7   :  { %v2644_v21 = vpop.xlane.xlu0 %134  ;;  %948 = vmatpush1.msra.mxu0 %v715_v12  ;;  %1019 = vmatpush1.msra.mxu1 %v717_v13  ;;  %v263_v45 = vrot.slane %v2642_v19, %v2545_v11 }
  0xe8   :  { %949 = vmatprep.subr.mxu0 %v712_v14  ;;  %1020 = vmatprep.subr.mxu1 %v714_v15  ;;  %v217_v49 = vrot.slane %v2644_v21, %v2545_v11 }
  0xe9   :  { %950 = vmatpush1.msra.mxu0 %v711_v16  ;;  %1021 = vmatpush1.msra.mxu1 %v713_v18  ;;  %v264_v2 = vsel %vm218_vm7, %v263_v45, %v259_v57  ;;  %v103_v16 = vld [vmem:[#allocation2] sm:$0x3]  ;;  %v2091_v45 = vld [vmem:[#allocation7 + $0x164] ss:$8 sps:$4 sm:$0xff]  }
  0xea   :  { %951 = vmatprep.subr.mxu0 %v708_v22  ;;  %1022 = vmatprep.subr.mxu1 %v710_v23  ;;  %v163_v37 = vpop.xlane.xlu1 %162  ;;  %v219_v3 = vsel %vm218_vm7, %v217_v49, %v212_v1  ;;  %v2296_v23 = vmov 1966171168   ;;  %v2086_v49 = vld [vmem:[#allocation7 + $0x60] ss:$8 sps:$4 sm:$0xff]   ;;  %v2094_v57 = vld [vmem:[#allocation7 + $0x54] ss:$8 sps:$4 sm:$0xff]  }
  0xeb   :  { %v138_v39 = vpop.xlane.xlu0 %137  ;;  %952 = vmatpush1.msra.mxu0 %v707_v25  ;;  %1023 = vmatpush1.msra.mxu1 %v709_v26  ;;  %v268_v10 = vrot.slane %v163_v37, %v2550_v17  ;;  %v460_v25 = vunpack.c.l.s4 %v2296_v23  ;;  %v456_v26 = vmul.f32 0.0001, %v2600_v63  ;;  %vm1892_vm7 = vcmask 74752  }
  0xec   :  { %953 = vmatprep.subr.mxu0 %v704_v24  ;;  %1024 = vmatprep.subr.mxu1 %v706_v27  ;;  %v224_v11 = vrot.slane %v138_v39, %v2550_v17  ;;  %v2085_v17 = vld [vmem:[#allocation7 + $0x174] ss:$8 sps:$4 sm:$0xff]   ;;  %v2080_v24 = vld [vmem:[#allocation7 + $0x70] ss:$8 sps:$4 sm:$0xff]   ;;  %v604_v39 = vmul.f32 1e-14, %v2600_v63 }
  0xed   :  { %954 = vmatpush1.msra.mxu0 %v703_v33  ;;  %1025 = vmatpush1.msra.mxu1 %v705_v34  ;;  %v269_v4 = vsel %vm225_vm8, %v268_v10, %v264_v2  ;;  %v2083_v34 = vld [vmem:[#allocation7 + $0x170] ss:$8 sps:$4 sm:$0xff]  }
  0xee   :  { %955 = vmatprep.subr.mxu0 %v700_v40  ;;  %1026 = vmatprep.subr.mxu1 %v702_v32  ;;  %v166_v50 = vpop.xlane.xlu1 %165  ;;  %v226_v8 = vsel %vm225_vm8, %v224_v11, %v219_v3  ;;  %v633_v40 = vmul.f32 1e-16, %v2600_v63  ;;  %v662_v32 = vmul.f32 1e-18, %v2600_v63 }
  0xef   :  { %v141_v51 = vpop.xlane.xlu0 %140  ;;  %956 = vmatpush1.msra.mxu0 %v699_v9  ;;  %1027 = vmatpush1.msra.mxu1 %v701_v36  ;;  %v273_v58 = vrot.slane %v166_v50, %v2555_v20 }
  0xf0   :  { %957 = vmatprep.subr.mxu0 %v696_v43  ;;  %1028 = vmatprep.subr.mxu1 %v698_v7  ;;  %v231_v59 = vrot.slane %v141_v51, %v2555_v20 }
  0xf1   :  { %958 = vmatpush1.msra.mxu0 %v695_v46  ;;  %1029 = vmatpush1.msra.mxu1 %v697_v47  ;;  %v274_v14 = vsel %vm232_vm9, %v273_v58, %v269_v4 }
  0xf2   :  { %959 = vmatprep.subr.mxu0 %v692_v52  ;;  %1030 = vmatprep.subr.mxu1 %v694_v53  ;;  %v169_v6 = vpop.xlane.xlu1 %168  ;;  %v233_v15 = vsel %vm232_vm9, %v231_v59, %v226_v8  ;;  %v2089_v53 = vld [vmem:[#allocation7 + $0x160] ss:$8 sps:$4 sm:$0xff]  }
  0xf3   :  { %v145_v20 = vpop.xlane.xlu0 %144  ;;  %960 = vmatpush1.msra.mxu0 %v691_v56  ;;  %993 = vmatprep.mubr.f32.mxu0 %v2295_v60  ;;  %v278_v12 = vrot.slane %v169_v6, %v2564_v29  ;;  %v2092_v6 = vld [vmem:[#allocation7 + $0x50] ss:$8 sps:$4 sm:$0xff]  }
  0xf4   :  { %v238_v13 = vrot.slane %v145_v20, %v2564_v29  ;;  %1031 = vmatpush1.msra.mxu1 %v693_v61  ;;  %1064 = vmatprep.mubr.f32.mxu1 %v2295_v60  ;;  %v461_v29 = vunpack.c.0.s8 %v460_v25 }
  0xf5   :  { %1509 = vmatprep.subr.bf16.mxu0 %v2082_v62  ;;  %1550 = vmatprep.subr.bf16.mxu1 %v2085_v17  ;;  %v279_v18 = vsel %vm239_vm10, %v278_v12, %v274_v14  ;;  %v2097_v17 = vld [vmem:[#allocation7 + $0x154] ss:$8 sps:$4 sm:$0xff]   ;;  %v2095_v14 = vld [vmem:[#allocation7 + $0x150] ss:$8 sps:$4 sm:$0xff]  }
  0xf6   :  { %v240_v19 = vsel %vm239_vm10, %v238_v13, %v233_v15  ;;  %v2752_v27 = vsub.s32 %v461_v29, %v2530_v0  ;;  %v2100_v15 = vld [vmem:[#allocation7 + $0x44] ss:$8 sps:$4 sm:$0xff]  }
  0xf7   :  { %v281_v21 = vsel %vm280_vm11, %v279_v18, %v240_v19 }
  0xf8   :  { %v283_v22 = vadd.f32 %v281_v21, %v103_v16 }
  0xfa   :  { %285 = vst.msk [vmem:[#allocation2] sm:$0x3] %vm84_vm2, %v283_v22  ;;  %v2103_v22 = vld [vmem:[#allocation7 + $0x144] ss:$8 sps:$4 sm:$0xff]  }
 0x101   :  { %v452_v33 = vld [vmem:[#allocation2] sm:$0x3] }
 0x102   :  { %v453_v37 = vmul.f32 0.015625, %v452_v33  ;;  %v2104_v33 = vld [vmem:[#allocation7 + $0x30] ss:$8 sps:$4 sm:$0xff]  }
 0x104   :  { %v457_v41 = vadd.f32 %v456_v26, %v453_v37  ;;  %v489_v5 = vadd.f32 %v488_v28, %v453_v37  ;;  %v518_v9 = vadd.f32 %v517_v31, %v453_v37  ;;  %v547_v36 = vadd.f32 %v546_v35, %v453_v37  ;;  %1922 = vmatmul.mubr.msk.f32.vlgmr.msra.gmra.mxu0 %vm755_vm12, %v453_v37  ;;  %v2101_v28 = vld [vmem:[#allocation7 + $0x140] ss:$8 sps:$4 sm:$0xff]   ;;  %v2106_v31 = vld [vmem:[#allocation7 + $0x34] ss:$8 sps:$4 sm:$0xff]  }
 0x105   :  { %v576_v43 = vadd.f32 %v575_v30, %v453_v37  ;;  %v605_v7 = vadd.f32 %v604_v39, %v453_v37  ;;  %v634_v38 = vadd.f32 %v633_v40, %v453_v37  ;;  %v663_v44 = vadd.f32 %v662_v32, %v453_v37  ;;  %1925 = vmatmul.mubr.msk.f32.vlgmr.msra.gmra.mxu1 %vm755_vm12, %v453_v37  ;;  %v2110_v35 = vld [vmem:[#allocation7 + $0x20] ss:$8 sps:$4 sm:$0xff]   ;;  %v2112_v30 = vld [vmem:[#allocation7 + $0x24] ss:$8 sps:$4 sm:$0xff]   ;;  %v2118_v40 = vld [vmem:[#allocation7 + $0x14] ss:$8 sps:$4 sm:$0xff]  }
 0x106   :  { %v465_v46 = vrot.slane %v457_v41, %v2752_v27  ;;  %v497_v47 = vrot.slane %v489_v5, %v2752_v27  ;;  %v526_v63 = vrot.slane %v518_v9, %v2752_v27  ;;  %v555_v48 = vrot.slane %v547_v36, %v2752_v27  ;;  %1510 = vmatpush1.bf16.msra.mxu0 %v2080_v24  ;;  %v2098_v24 = vld [vmem:[#allocation7 + $0x40] ss:$8 sps:$4 sm:$0xff]   ;;  %v2115_v39 = vld [vmem:[#allocation7 + $0x124] ss:$8 sps:$4 sm:$0xff]   ;;  %v2116_v32 = vld [vmem:[#allocation7 + $0x10] ss:$8 sps:$4 sm:$0xff]  }
 0x107   :  { %v584_v10 = vrot.slane %v576_v43, %v2752_v27  ;;  %v613_v50 = vrot.slane %v605_v7, %v2752_v27  ;;  %v642_v51 = vrot.slane %v634_v38, %v2752_v27  ;;  %v671_v52 = vrot.slane %v663_v44, %v2752_v27  ;;  %1551 = vmatpush1.bf16.msra.mxu1 %v2083_v34  ;;  %v2107_v34 = vld [vmem:[#allocation7 + $0x130] ss:$8 sps:$4 sm:$0xff]   ;;  %v2113_v37 = vld [vmem:[#allocation7 + $0x120] ss:$8 sps:$4 sm:$0xff]   ;;  %v2121_v41 = vld [vmem:[#allocation7 + $0x114] ss:$8 sps:$4 sm:$0xff]  }
 0x108   :  { %v466_v54 = vcombine.high %v465_v46, %v465_v46  ;;  %v473_v55 = vrot.slane %v465_v46, %v2752_v27  ;;  %v498_v11 = vcombine.high %v497_v47, %v497_v47  ;;  %v505_v56 = vrot.slane %v497_v47, %v2752_v27  ;;  %1511 = vmatprep.subr.bf16.mxu0 %v2088_v42  ;;  %v2119_v5 = vld [vmem:[#allocation7 + $0x110] ss:$8 sps:$4 sm:$0xff]   ;;  %v2124_v9 = vld [vmem:[#allocation7 + $0x4] ss:$8 sps:$4 sm:$0xff]   ;;  %v2122_v42 = vld [vmem:[#allocation7] ss:$8 sps:$4 sm:$0xff]  }
 0x109   :  { %v527_v58 = vcombine.high %v526_v63, %v526_v63  ;;  %v534_v59 = vrot.slane %v526_v63, %v2752_v27  ;;  %v556_v61 = vcombine.high %v555_v48, %v555_v48  ;;  %v563_v62 = vrot.slane %v555_v48, %v2752_v27  ;;  %1552 = vmatprep.subr.bf16.mxu1 %v2091_v45  ;;  %v2127_v36 = vld [vmem:[#allocation7 + $0x104] ss:$8 sps:$4 sm:$0xff]   ;;  %v2125_v43 = vld [vmem:[#allocation7 + $0x100] ss:$8 sps:$4 sm:$0xff]   ;;  %v2130_v7 = vld [vmem:[#allocation7 + $0xf4] ss:$8 sps:$4 sm:$0xff]  }
 0x10a   :  { %v480_v1 = vrot.slane %v466_v54, %v2752_v27  ;;  %484 = vst.msk [vmem:[%s2930_s11] sm:$0x1] %vm483_vm13, %v473_v55  ;;  %486 = vst.msk [vmem:[%s2930_s11 + $0x1] sm:$0x1] %vm483_vm13, %v473_v55  ;;  %v512_v2 = vrot.slane %v498_v11, %v2752_v27  ;;  %v585_v3 = vcombine.high %v584_v10, %v584_v10  ;;  %1512 = vmatpush1.bf16.msra.mxu0 %v2086_v49  ;;  %v2133_v38 = vld [vmem:[#allocation7 + $0x1f4] ss:$8 sps:$4 sm:$0xff]  }
 0x10b   :  { %515 = vst.msk [vmem:[%s2930_s11 + $0x2] sm:$0x1] %vm483_vm13, %v505_v56  ;;  %v592_v4 = vrot.slane %v584_v10, %v2752_v27  ;;  %v541_v20 = vrot.slane %v527_v58, %v2752_v27  ;;  %544 = vst.msk [vmem:[%s2930_s11 + $0x3] sm:$0x1] %vm483_vm13, %v534_v59  ;;  %v570_v8 = vrot.slane %v556_v61, %v2752_v27  ;;  %1553 = vmatpush1.bf16.msra.mxu1 %v2089_v53  ;;  %v2128_v44 = vld [vmem:[#allocation7 + $0xf0] ss:$8 sps:$4 sm:$0xff]  }
 0x10c   :  { %573 = vst.msk [vmem:[%s2930_s11 + $0x4] sm:$0x1] %vm483_vm13, %v563_v62  ;;  %v614_v12 = vcombine.high %v613_v50, %v613_v50  ;;  %v621_v13 = vrot.slane %v613_v50, %v2752_v27  ;;  %485 = vst.msk [vmem:[%s2930_s11 + $0x10] sm:$0x1] %vm483_vm13, %v480_v1  ;;  %v599_v16 = vrot.slane %v585_v3, %v2752_v27  ;;  %1513 = vmatprep.subr.bf16.mxu0 %v2094_v57  ;;  %v2131_v45 = vld [vmem:[#allocation7 + $0x1f0] ss:$8 sps:$4 sm:$0xff]  }
 0x10d   :  { %487 = vst.msk [vmem:[%s2930_s11 + $0x11] sm:$0x1] %vm483_vm13, %v480_v1  ;;  %516 = vst.msk [vmem:[%s2930_s11 + $0x12] sm:$0x1] %vm483_vm13, %v512_v2  ;;  %v643_v18 = vcombine.high %v642_v51, %v642_v51  ;;  %v650_v19 = vrot.slane %v642_v51, %v2752_v27  ;;  %v672_v21 = vcombine.high %v671_v52, %v671_v52  ;;  %1554 = vmatprep.subr.bf16.mxu1 %v2097_v17  ;;  %v2136_v46 = vld [vmem:[#allocation7 + $0xe4] ss:$8 sps:$4 sm:$0xff]  }
 0x10e   :  { %602 = vst.msk [vmem:[%s2930_s11 + $0x5] sm:$0x1] %vm483_vm13, %v592_v4  ;;  %545 = vst.msk [vmem:[%s2930_s11 + $0x13] sm:$0x1] %vm483_vm13, %v541_v20  ;;  %v628_v23 = vrot.slane %v614_v12, %v2752_v27  ;;  %v679_v25 = vrot.slane %v671_v52, %v2752_v27  ;;  %1514 = vmatpush1.bf16.msra.mxu0 %v2092_v6  ;;  %v2139_v47 = vld [vmem:[#allocation7 + $0x1e4] ss:$8 sps:$4 sm:$0xff]  }
 0x10f   :  { %574 = vst.msk [vmem:[%s2930_s11 + $0x14] sm:$0x1] %vm483_vm13, %v570_v8  ;;  %631 = vst.msk [vmem:[%s2930_s11 + $0x6] sm:$0x1] %vm483_vm13, %v621_v13  ;;  %v657_v29 = vrot.slane %v643_v18, %v2752_v27  ;;  %v686_v26 = vrot.slane %v672_v21, %v2752_v27  ;;  %1555 = vmatpush1.bf16.msra.mxu1 %v2095_v14  ;;  %1515 = vmatprep.subr.bf16.mxu0 %v2100_v15  ;;  %v2109_v27 = vld [vmem:[#allocation7 + $0x134] ss:$8 sps:$4 sm:$0xff]  }
 0x110   :  { %603 = vst.msk [vmem:[%s2930_s11 + $0x15] sm:$0x1] %vm483_vm13, %v599_v16  ;;  %660 = vst.msk [vmem:[%s2930_s11 + $0x7] sm:$0x1] %vm483_vm13, %v650_v19  ;;  %1556 = vmatprep.subr.bf16.mxu1 %v2103_v22  ;;  %v2134_v63 = vld [vmem:[#allocation7 + $0xe0] ss:$8 sps:$4 sm:$0xff]  }
 0x111   :  { %632 = vst.msk [vmem:[%s2930_s11 + $0x16] sm:$0x1] %vm483_vm13, %v628_v23  ;;  %689 = vst.msk [vmem:[%s2930_s11 + $0x8] sm:$0x1] %vm483_vm13, %v679_v25  ;;  %v2137_v48 = vld [vmem:[#allocation7 + $0x1e0] ss:$8 sps:$4 sm:$0xff]  }
 0x112   :  { %661 = vst.msk [vmem:[%s2930_s11 + $0x17] sm:$0x1] %vm483_vm13, %v657_v29  ;;  %690 = vst.msk [vmem:[%s2930_s11 + $0x18] sm:$0x1] %vm483_vm13, %v686_v26  ;;  %1516 = vmatpush1.bf16.msra.mxu0 %v2098_v24  ;;  %v2142_v49 = vld [vmem:[#allocation7 + $0xd4] ss:$8 sps:$4 sm:$0xff]  }
 0x113   :  { %1557 = vmatpush1.bf16.msra.mxu1 %v2101_v28  ;;  %1517 = vmatprep.subr.bf16.mxu0 %v2106_v31  ;;  %v2145_v10 = vld [vmem:[#allocation7 + $0x1d4] ss:$8 sps:$4 sm:$0xff]   ;;  %v2140_v50 = vld [vmem:[#allocation7 + $0xd0] ss:$8 sps:$4 sm:$0xff]   ;;  %v2148_v52 = vld [vmem:[#allocation7 + $0xc4] ss:$8 sps:$4 sm:$0xff]  }
 0x114   :  { %1558 = vmatprep.subr.bf16.mxu1 %v2109_v27  ;;  %v2143_v51 = vld [vmem:[#allocation7 + $0x1d0] ss:$8 sps:$4 sm:$0xff]   ;;  %v2151_v53 = vld [vmem:[#allocation7 + $0x1c4] ss:$8 sps:$4 sm:$0xff]   ;;  %v2146_v54 = vld [vmem:[#allocation7 + $0xc0] ss:$8 sps:$4 sm:$0xff]  }
 0x115   :  { %v2149_v55 = vld [vmem:[#allocation7 + $0x1c0] ss:$8 sps:$4 sm:$0xff]   ;;  %v2154_v11 = vld [vmem:[#allocation7 + $0xb4] ss:$8 sps:$4 sm:$0xff]   ;;  %v2152_v57 = vld [vmem:[#allocation7 + $0xb0] ss:$8 sps:$4 sm:$0xff]  }
 0x116   :  { %1518 = vmatpush1.bf16.msra.mxu0 %v2104_v33  ;;  %v2157_v56 = vld [vmem:[#allocation7 + $0x1b4] ss:$8 sps:$4 sm:$0xff]   ;;  %v2155_v58 = vld [vmem:[#allocation7 + $0x1b0] ss:$8 sps:$4 sm:$0xff]   ;;  %v2160_v59 = vld [vmem:[#allocation7 + $0xa4] ss:$8 sps:$4 sm:$0xff]  }
 0x117   :  { %1559 = vmatpush1.bf16.msra.mxu1 %v2107_v34  ;;  %1519 = vmatprep.subr.bf16.mxu0 %v2112_v30  ;;  %v2163_v61 = vld [vmem:[#allocation7 + $0x1a4] ss:$8 sps:$4 sm:$0xff]   ;;  %v2158_v62 = vld [vmem:[#allocation7 + $0xa0] ss:$8 sps:$4 sm:$0xff]   ;;  %v2166_v1 = vld [vmem:[#allocation7 + $0x94] ss:$8 sps:$4 sm:$0xff]  }
 0x118   :  { %1560 = vmatprep.subr.bf16.mxu1 %v2115_v39  ;;  %v2161_v17 = vld [vmem:[#allocation7 + $0x1a0] ss:$8 sps:$4 sm:$0xff]   ;;  %v2169_v2 = vld [vmem:[#allocation7 + $0x194] ss:$8 sps:$4 sm:$0xff]   ;;  %v2164_v3 = vld [vmem:[#allocation7 + $0x90] ss:$8 sps:$4 sm:$0xff]  }
 0x119   :  { %v2167_v4 = vld [vmem:[#allocation7 + $0x190] ss:$8 sps:$4 sm:$0xff]   ;;  %v2172_v6 = vld [vmem:[#allocation7 + $0x84] ss:$8 sps:$4 sm:$0xff]   ;;  %v2170_v8 = vld [vmem:[#allocation7 + $0x80] ss:$8 sps:$4 sm:$0xff]  }
 0x11a   :  { %1520 = vmatpush1.bf16.msra.mxu0 %v2110_v35  ;;  %v2175_v20 = vld [vmem:[#allocation7 + $0x184] ss:$8 sps:$4 sm:$0xff]   ;;  %v2173_v12 = vld [vmem:[#allocation7 + $0x180] ss:$8 sps:$4 sm:$0xff]   ;;  %v2176_v13 = vld [vmem:[#allocation9 + $0x78] sm:$0xff]   ;;  %v1075_v16 = vsub.s32 0, %v2530_v0 }
 0x11b   :  { %1561 = vmatpush1.bf16.msra.mxu1 %v2113_v37  ;;  %1521 = vmatprep.subr.bf16.mxu0 %v2118_v40  ;;  %v1071_v18 = vld [vmem:[%s2922_s3] sm:$0xf]  ;;  %v1083_v19 = vsub.s32 2, %v2530_v0  ;;  %v1079_v21 = vsub.s32 1, %v2530_v0  ;;  %v1087_v23 = vsub.s32 3, %v2530_v0 }
 0x11c   :  { %1562 = vmatprep.subr.bf16.mxu1 %v2121_v41  ;;  %v1076_v29 = vrot.slane %v1071_v18, %v1075_v16 }
 0x11d   :  { %v1084_v24 = vrot.slane %v1071_v18, %v1083_v19  ;;  %v1080_v27 = vrot.slane %v1071_v18, %v1079_v21  ;;  %v1088_v35 = vrot.slane %v1071_v18, %v1087_v23 }
 0x11e   :  { %1522 = vmatpush1.bf16.msra.mxu0 %v2116_v32 }
 0x11f   :  { %1563 = vmatpush1.bf16.msra.mxu1 %v2119_v5  ;;  %1523 = vmatprep.subr.bf16.mxu0 %v2124_v9 }
 0x120   :  { %1564 = vmatprep.subr.bf16.mxu1 %v2127_v36 }
 0x122   :  { %1524 = vmatpush1.bf16.msra.mxu0 %v2122_v42 }
 0x123   :  { %1565 = vmatpush1.bf16.msra.mxu1 %v2125_v43  ;;  %1525 = vmatprep.subr.bf16.mxu0 %v2130_v7 }
 0x124   :  { %1566 = vmatprep.subr.bf16.mxu1 %v2133_v38 }
 0x126   :  { %1526 = vmatpush2.bf16.msra.mxu0 %v2128_v44 }
 0x127   :  { %1567 = vmatpush2.bf16.msra.mxu1 %v2131_v45  ;;  %1527 = vmatprep.subr.bf16.mxu0 %v2136_v46 }
 0x128   :  { %1568 = vmatprep.subr.bf16.mxu1 %v2139_v47  ;;  %v2177_v47 = vld [vmem:[#allocation9 + $0x38] sm:$0xff]  }
 0x12a   :  { %1528 = vmatpush2.bf16.msra.mxu0 %v2134_v63 }
 0x12b   :  { %1569 = vmatpush2.bf16.msra.mxu1 %v2137_v48  ;;  %1529 = vmatprep.subr.bf16.mxu0 %v2142_v49  ;;  %v2178_v49 = vld [vmem:[#allocation9 + $0x70] sm:$0xff]  }
 0x12c   :  { %1570 = vmatprep.subr.bf16.mxu1 %v2145_v10 }
 0x12e   :  { %1530 = vmatpush2.bf16.msra.mxu0 %v2140_v50  ;;  %v2179_v50 = vld [vmem:[#allocation9 + $0x30] sm:$0xff]  }
 0x12f   :  { %1571 = vmatpush2.bf16.msra.mxu1 %v2143_v51  ;;  %1531 = vmatprep.subr.bf16.mxu0 %v2148_v52  ;;  %v2180_v51 = vld [vmem:[#allocation9 + $0x68] sm:$0xff]  }
 0x130   :  { %1572 = vmatprep.subr.bf16.mxu1 %v2151_v53  ;;  %v2181_v52 = vld [vmem:[#allocation9 + $0x28] sm:$0xff]   ;;  %v2182_v53 = vld [vmem:[#allocation9 + $0x60] sm:$0xff]  }
 0x132   :  { %1532 = vmatpush2.bf16.msra.mxu0 %v2146_v54  ;;  %v2183_v54 = vld [vmem:[#allocation9 + $0x20] sm:$0xff]  }
 0x133   :  { %1573 = vmatpush2.bf16.msra.mxu1 %v2149_v55  ;;  %1533 = vmatprep.subr.bf16.mxu0 %v2154_v11  ;;  %v2184_v55 = vld [vmem:[#allocation9 + $0x58] sm:$0xff]  }
 0x134   :  { %1574 = vmatprep.subr.bf16.mxu1 %v2157_v56  ;;  %v2185_v11 = vld [vmem:[#allocation9 + $0x18] sm:$0xff]   ;;  %v2186_v56 = vld [vmem:[#allocation9 + $0x50] sm:$0xff]  }
 0x136   :  { %1534 = vmatpush2.bf16.msra.mxu0 %v2152_v57  ;;  %v2187_v57 = vld [vmem:[#allocation9 + $0x10] sm:$0xff]  }
 0x137   :  { %1575 = vmatpush2.bf16.msra.mxu1 %v2155_v58  ;;  %1535 = vmatprep.subr.bf16.mxu0 %v2160_v59  ;;  %v2188_v58 = vld [vmem:[#allocation9 + $0x48] sm:$0xff]  }
 0x138   :  { %1576 = vmatprep.subr.bf16.mxu1 %v2163_v61  ;;  %v2189_v59 = vld [vmem:[#allocation9 + $0x8] sm:$0xff]   ;;  %v2190_v61 = vld [vmem:[#allocation9 + $0x40] sm:$0xff]  }
 0x13a   :  { %1536 = vmatpush2.bf16.msra.mxu0 %v2158_v62  ;;  %v2191_v62 = vld [vmem:[#allocation9] sm:$0xff]  }
 0x13b   :  { %1577 = vmatpush2.bf16.msra.mxu1 %v2161_v17  ;;  %1537 = vmatprep.subr.bf16.mxu0 %v2166_v1  ;;  %v2192_v17 = vld [vmem:[%s2927_s8 + $0x38] sm:$0xff]   ;;  %v2193_v1 = vld [vmem:[%s2927_s8 + $0x30] sm:$0xff]  }
 0x13c   :  { %1578 = vmatprep.subr.bf16.mxu1 %v2169_v2  ;;  %v2194_v2 = vld [vmem:[%s2927_s8 + $0x28] sm:$0xff]  }
 0x13e   :  { %1538 = vmatpush2.bf16.msra.mxu0 %v2164_v3  ;;  %v2195_v3 = vld [vmem:[%s2927_s8 + $0x20] sm:$0xff]  }
 0x13f   :  { %1579 = vmatpush2.bf16.msra.mxu1 %v2167_v4  ;;  %1539 = vmatprep.subr.bf16.mxu0 %v2172_v6  ;;  %v2196_v4 = vld [vmem:[%s2927_s8 + $0x18] sm:$0xff]   ;;  %v1177_v6 = vld [vmem:[%s2924_s5] sm:$0x3] }
 0x140   :  { %1580 = vmatprep.subr.bf16.mxu1 %v2175_v20  ;;  %v1182_v20 = vrot.slane %v1177_v6, %v1075_v16 }
 0x142   :  { %1540 = vmatpush2.bf16.msra.mxu0 %v2170_v8  ;;  %v1186_v8 = vrot.slane %v1177_v6, %v1079_v21 }
 0x143   :  { %1581 = vmatpush2.bf16.msra.mxu1 %v2173_v12  ;;  %2016 = vmatprep.subr.bf16.mxu0 %v2176_v13 }
 0x144   :  { %2047 = vmatprep.subr.bf16.mxu1 %v2295_v60 }
 0x1a4   :  { %v838_v14 = vpop.f32.mrf.mxu0  ;;  %v909_v15 = vpop.f32.mrf.mxu1 }
 0x1a6   :  { %v840_v22 = vpop.f32.mrf.mxu0  ;;  %v911_v25 = vpop.f32.mrf.mxu1 }
 0x1c4   :  { %v995_v26 = vpop.f32.mrf.mxu0 }
 0x1c5   :  { %v996_v28 = vadd.f32 %v995_v26, %v838_v14  ;;  %v1066_v31 = vpop.f32.mrf.mxu1 }
 0x1c6   :  { %v1067_v33 = vadd.f32 %v1066_v31, %v909_v15  ;;  %v997_v34 = vpop.f32.mrf.mxu0 }
 0x1c7   :  { %v1093_v30 = vadd.f32 %v1076_v29, %v996_v28  ;;  %v998_v37 = vadd.f32 %v997_v34, %v840_v22  ;;  %v1068_v39 = vpop.f32.mrf.mxu1  ;;  %v2198_v34 = vld [vmem:[%s2927_s8 + $0x8] sm:$0xff]  }
 0x1c8   :  { %v1095_v40 = vadd.f32 %v1084_v24, %v1067_v33  ;;  %v1069_v32 = vadd.f32 %v1068_v39, %v911_v25  ;;  %v2197_v33 = vld [vmem:[%s2927_s8 + $0x10] sm:$0xff]  }
 0x1c9   :  { %vm1097_vm14 = vcmp.ge.f32.partialorder %v1093_v30, 0.0  ;;  %v1101_v41 = vmul.f32 0.01, %v1093_v30  ;;  %v1094_v5 = vadd.f32 %v1080_v27, %v998_v37  ;;  %v1990_v37 = vld [vmem:[%s2926_s7] ss:$0 sm:$0xff]  ;;  %s2260_s7 = scalar_lea.vmem %s1901_s28, 32 }
 0x1ca   :  { %vm1099_vm15 = vcmp.ge.f32.partialorder %v1095_v40, 0.0  ;;  %v1103_v9 = vmul.f32 0.01, %v1095_v40  ;;  %v1096_v36 = vadd.f32 %v1088_v35, %v1069_v32  ;;  %v2199_v35 = vld [vmem:[%s2927_s8] sm:$0xff]   ;;  %p2261_p1 = scmp.ne.s32.totalorder %s1901_s28, %s2260_s7  ;;  %p2266_p3 = scmp.lt.s32.totalorder %s2260_s7, %s2260_s7 }
 0x1cb   :  { %v1102_v42 = vmul.f32 0.01, %v1094_v5  ;;  %vm1098_vm0 = vcmp.ge.f32.partialorder %v1094_v5, 0.0  ;;  %v1105_v43 = vsel %vm1097_vm14, %v1093_v30, %v1101_v41 }
 0x1cc   :  { %v1104_v7 = vmul.f32 0.01, %v1096_v36  ;;  %vm1100_vm1 = vcmp.ge.f32.partialorder %v1096_v36, 0.0  ;;  %v1107_v38 = vsel %vm1099_vm15, %v1095_v40, %v1103_v9  ;;  %v1109_v63 = vpack.c.bf16 %v1105_v43, %v1105_v43  ;;  %p2267_p4 = por %p2266_p3, %p2265_p2 }
 0x1cd   :  { %v1106_v44 = vsel %vm1098_vm0, %v1094_v5, %v1102_v42  ;;  %v1111_v10 = vpack.c.bf16 %v1107_v38, %v1107_v38 }
 0x1ce   :  { %v1110_v45 = vpack.c.bf16 %v1106_v44, %v1106_v44  ;;  %v1108_v46 = vsel %vm1100_vm1, %v1096_v36, %v1104_v7  ;;  %p2268_p5 = pnand %p2267_p4, %p2261_p1 }
 0x1cf   :  { %v1112_v48 = vpack.c.bf16 %v1108_v46, %v1108_v46 }
 0x1d0   :  { %1541 = vmatprep.mubr.bf16.mxu0 %v1110_v45 }
 0x1d1   :  { %1582 = vmatprep.mubr.bf16.mxu1 %v1112_v48  ;;  %1542 = vmatmul.mubr.bf16.vlgmr.msra.gmra.mxu0 %v1109_v63 }
 0x1d2   :  { %1583 = vmatmul.mubr.bf16.vlgmr.msra.gmra.mxu1 %v1111_v10  ;;  %2017 = vmatpush3.bf16.msra.mxu0 %v2177_v47 }
 0x1d3   :  { %2018 = vmatprep.subr.bf16.mxu0 %v2178_v49  ;;  %2048 = vmatpush3.bf16.msra.mxu1 %v2192_v17 }
 0x1d4   :  { %2049 = vmatprep.subr.bf16.mxu1 %v2295_v60  ;;  %2063 = vmatprep.mubr.msk.bf16.mxu1 %vm2297_vm4, %v2295_v60 }
 0x1d6   :  { %2019 = vmatpush3.bf16.msra.mxu0 %v2179_v50 }
 0x1d7   :  { %2020 = vmatprep.subr.bf16.mxu0 %v2180_v51  ;;  %2050 = vmatpush3.bf16.msra.mxu1 %v2193_v1 }
 0x1d8   :  { %2051 = vmatprep.subr.bf16.mxu1 %v2295_v60 }
 0x1da   :  { %2021 = vmatpush3.bf16.msra.mxu0 %v2181_v52 }
 0x1db   :  { %2022 = vmatprep.subr.bf16.mxu0 %v2182_v53  ;;  %2052 = vmatpush3.bf16.msra.mxu1 %v2194_v2 }
 0x1dc   :  { %2053 = vmatprep.subr.bf16.mxu1 %v2295_v60 }
 0x1de   :  { %2023 = vmatpush3.bf16.msra.mxu0 %v2183_v54 }
 0x1df   :  { %2024 = vmatprep.subr.bf16.mxu0 %v2184_v55  ;;  %2054 = vmatpush3.bf16.msra.mxu1 %v2195_v3 }
 0x1e0   :  { %2055 = vmatprep.subr.bf16.mxu1 %v2295_v60 }
 0x1e2   :  { %2025 = vmatpush3.bf16.msra.mxu0 %v2185_v11 }
 0x1e3   :  { %2026 = vmatprep.subr.bf16.mxu0 %v2186_v56  ;;  %2056 = vmatpush3.bf16.msra.mxu1 %v2196_v4 }
 0x1e4   :  { %2057 = vmatprep.subr.bf16.mxu1 %v2295_v60 }
 0x1e6   :  { %2027 = vmatpush3.bf16.msra.mxu0 %v2187_v57 }
 0x1e7   :  { %2028 = vmatprep.subr.bf16.mxu0 %v2188_v58  ;;  %2058 = vmatpush3.bf16.msra.mxu1 %v2197_v33 }
 0x1e8   :  { %2059 = vmatprep.subr.bf16.mxu1 %v2295_v60 }
 0x1ea   :  { %2029 = vmatpush3.bf16.msra.mxu0 %v2189_v59 }
 0x1eb   :  { %2030 = vmatprep.subr.bf16.mxu0 %v2190_v61  ;;  %2060 = vmatpush3.bf16.msra.mxu1 %v2198_v34 }
 0x1ec   :  { %2061 = vmatprep.subr.bf16.mxu1 %v2295_v60  ;;  %v2007_v60 = vld [vmem:[%s2928_s9] ss:$0 sm:$0xff] }
 0x1ee   :  { %2031 = vmatpush3.bf16.msra.mxu0 %v2191_v62 }
 0x1ef   :  { %2062 = vmatpush3.bf16.msra.mxu1 %v2199_v35 }
 0x291   :  { %v1543_v12 = vpop.f32.mrf.mxu0 }
 0x292   :  { %v1544_v13 = vadd.f32 %v1543_v12, %v1182_v20  ;;  %v1584_v14 = vpop.f32.mrf.mxu1 }
 0x293   :  { %v1545_v15 = vpop.f32.mrf.mxu0 }
 0x294   :  { %v1585_v18 = vadd.f32 %v1584_v14, %v1544_v13  ;;  %v1546_v19 = vadd.f32 %v1545_v15, %v1186_v8  ;;  %v1586_v22 = vpop.f32.mrf.mxu1 }
 0x295   :  { %v1547_v23 = vpop.f32.mrf.mxu0 }
 0x296   :  { %vm1591_vm2 = vcmp.ge.f32.partialorder %v1585_v18, 0.0  ;;  %v1593_v25 = vmul.f32 0.01, %v1585_v18  ;;  %v1587_v29 = vadd.f32 %v1586_v22, %v1546_v19  ;;  %v1588_v26 = vpop.f32.mrf.mxu1 }
 0x297   :  { %v1548_v24 = vpop.f32.mrf.mxu0 }
 0x298   :  { %vm1592_vm3 = vcmp.ge.f32.partialorder %v1587_v29, 0.0  ;;  %v1594_v28 = vmul.f32 0.01, %v1587_v29  ;;  %v1589_v31 = vpop.f32.mrf.mxu1  ;;  %v1595_v16 = vsel %vm1591_vm2, %v1585_v18, %v1593_v25 }
 0x299   :  { %v1597_v21 = vpack.c.bf16 %v1595_v16, %v1595_v16 }
 0x29a   :  { %v1596_v27 = vsel %vm1592_vm3, %v1587_v29, %v1594_v28 }
 0x29b   :  { %v1598_v0 = vpack.c.bf16 %v1596_v27, %v1596_v27 }
 0x29d   :  { %1766 = vmatprep.mubr.bf16.mxu0 %v1598_v0 }
 0x29e   :  { %1767 = vmatmul.mubr.bf16.vlgmr.msra.gmra.mxu0 %v1597_v21 }
 0x35e   :  { %v2032_v30 = vpop.f32.mrf.mxu0 }
 0x360   :  { %v2033_v39 = vpop.f32.mrf.mxu0 }
 0x361   :  { %v2034_v40 = vadd.f32 %v2033_v39, %v2032_v30 }
 0x362   :  { %v2035_v32 = vpop.f32.mrf.mxu0 }
 0x363   :  { %v1769_v41 = vadd.f32 %v2034_v40, %v1990_v37 }
 0x364   :  { %v2036_v5 = vpop.f32.mrf.mxu0 }
 0x365   :  { %vm1774_vm5 = vcmp.ge.f32.partialorder %v1769_v41, 0.0  ;;  %v1775_v9 = vmul.f32 0.01, %v1769_v41 }
 0x367   :  { %v1776_v36 = vsel %vm1774_vm5, %v1769_v41, %v1775_v9 }
 0x368   :  { %v1777_v42 = vpack.c.bf16 %v1776_v36, %v1776_v36 }
 0x36a   :  { %2064 = vmatmul.mubr.bf16.vlgmr.msra.gmra.mxu1 %v1777_v42 }
 0x42a   :  { %v1883_v43 = vpop.f32.mrf.mxu1 }
 0x42b   :  { %v1884_v7 = vadd.f32 %v2007_v60, %v1883_v43 }
 0x42c   :  { %v2065_v38 = vpop.f32.mrf.mxu1 }
 0x42d   :  { %vm1889_vm6 = vcmp.ge.f32.partialorder %v1884_v7, 0.0  ;;  %v1890_v44 = vmul.f32 0.01, %v1884_v7 }
 0x42e   :  { %v1886_v45 = vpop.f32.mrf.mxu1 }
 0x42f   :  { %v1891_v46 = vsel %vm1889_vm6, %v1884_v7, %v1890_v44 }
 0x430   :  { %v2066_v47 = vpop.f32.mrf.mxu1  ;;  %1893 = vst.msk [vmem:[#allocation10] sm:$0x3] %vm1892_vm7, %v1891_v46 }
 0x431   :  { %2271 = shalt.err (!%p2268_p5)
}
 0x432   :  { %1903 = dma.vmem_to_hbm [thread:$0]  %s1901_s28, 32, %s2929_s10, [#allocation6]  }
 0x433   :  { %2284 = dma.done.wait [#allocation6], 32  }
 0x434   :  { %2285 = vsyncadd [#allocation6], 4294967264 }
 0x435   :  { %1911 = vsyncpa [#allocation5], 1 }
 0x436   :  { %1912 = vsyncpa [#allocation8], 1 }
 0x437   :  { %1913 = vsyncpa [#allocation6], 1 }

</bundles_post_ra>
